<compile_context>
chip_gen: v6e
topology: v6e:2x2x1
jax: 0.10.0
libtpu: 0.0.40
codegen_flags: <defaults>
</compile_context>

<pallas_src>
import functools

import jax
import jax.numpy as jnp
from jax.experimental import pallas as pl
from jax.experimental.pallas import tpu as pltpu


# ----------------------------------------------------------------------------
# Pallas kernel: one (core c, batch b, node-block j) step.
# ----------------------------------------------------------------------------
def _attn_head_kernel(x_ref, w1_ref, aw_ref, maskT_ref, o_ref,
                      frow_ref, gmax_ref, *, tj, nj_per_core):
    # Views per grid step (c, b, j):
    #   x_ref:     (C, Np)   node features of batch b (core/batch dims squeezed)
    #   w1_ref:    (F, C)    conv1 1x1 weight
    #   aw_ref:    (C, 1)    (a1 @ w1)^T  -- conv2_1 folded through conv1
    #   maskT_ref: (TJ, Np)  int8 adjacency mask block (transposed frame)
    #   o_ref:     (F, Np)   f32 partial output (resident accumulator over j)
    #   frow_ref:  (1, Np)   scratch: f[n] = conv2_1(conv1(x))[n]
    #   gmax_ref:  (1, 1)    scratch: per-batch softmax shift bound
    c = pl.program_id(0)
    j = pl.program_id(2)

    @pl.when(j == 0)
    def _init():
        # f = conv2_1(conv1(x)) as VPU broadcast-mul + sublane reduction
        # (avoids an M=1 MXU matmul that fills 1/128 of the array).
        frow = jnp.sum(x_ref[...] * aw_ref[...], axis=0, keepdims=True)
        frow_ref[...] = frow
        # Per-batch upper bound for the softmax shift (bias <= 0, leakyrelu
        # monotone, softmax shift-invariant) -> no per-row XLU max pass.
        gmax_ref[...] = jnp.max(frow, axis=-1, keepdims=True)
        o_ref[...] = jnp.zeros_like(o_ref)

    off = pl.multiple_of((c * nj_per_core + j) * tj, 128)

    # seq_fts for this node block: (F, TJ), f32 on the MXU.
    x_blk = x_ref[:, pl.ds(off, tj)]
    seq_blk = jnp.dot(w1_ref[...], x_blk, preferred_element_type=jnp.float32)

    # Transposed-frame logits: lg[p, i] = leakyrelu(f[p] + f[i])
    # (logits are symmetric because the module uses conv2_1 for both terms).
    f_row = frow_ref[...]                                   # (1, Np)
    f_col = jnp.transpose(frow_ref[:, pl.ds(off, tj)])      # (TJ, 1)
    lg = f_col + f_row                                      # (TJ, Np)
    lg = jnp.maximum(lg, 0.01 * lg)                         # LeakyReLU(0.01)

    m = f_col + gmax_ref[...]                               # (TJ, 1) bound
    m = jnp.maximum(m, 0.01 * m)

    # exp(lg - m) <= 1 always; multiply-masking gives exactly 0 where the
    # 0/-1e9 bias would have killed the coefficient.
    e = jnp.exp(lg - m) * maskT_ref[...].astype(jnp.float32)  # (TJ, Np)

    # Deferred softmax normalization: fold 1/d[p] into seq_fts columns
    # (F*TJ multiplies instead of N^2 divides).
    d = jnp.sum(e, axis=-1, keepdims=True)                  # (TJ, 1)
    inv_d = pl.reciprocal(d, approx=True)                   # EUP slot
    seq_scaled = seq_blk * jnp.transpose(inv_d)             # (F, TJ)

    # out[f, i] += sum_p seq_scaled[f, p] * e[p, i] -- canonical MXU
    # contraction, f32 (MXU has large slack at small F).
    o_ref[...] += jnp.dot(seq_scaled, e, preferred_element_type=jnp.float32)


# ----------------------------------------------------------------------------
# Wrapper
# ----------------------------------------------------------------------------
def _vmem_capacity_bytes():
    try:
        info = pltpu.get_tpu_info()
        cap = int(getattr(info, "vmem_capacity_bytes", 0) or 0)
        if cap > 0:
            return cap
    except Exception:
        pass
    return 64 * 1024 * 1024   # safe floor (v7x per-TC physical VMEM)


def attn_head(x, w1, a1, bias_mat, *, tj=None):
    """Attn_head.forward with in_drop=coef_drop=0 and activation=ELU.

    x: (B, C, N), w1: (F, C) [conv1 weight], a1: (1, F) [conv2_1 weight],
    bias_mat: (N, N) standard GAT bias (0 for edges, -1e9 otherwise).
    Returns (B, F, N) float32.
    """
    B, C, N = x.shape
    F = w1.shape[0]
    assert w1.shape == (F, C) and a1.shape == (1, F) and bias_mat.shape == (N, N)

    x = x.astype(jnp.float32)
    w1 = w1.astype(jnp.float32)
    aw_col = jnp.transpose(a1.astype(jnp.float32) @ w1)          # (C, 1)

    # Compress the only O(N^2) operand: the 0/-1e9 GAT bias is an adjacency
    # mask; stream it as int8 and re-apply in kernel.
    # TODO(synk): general finite-valued bias matrices would need a bf16 bias
    # stream instead of the 0/1 mask (HeteGAT_multi only uses 0/-1e9).
    maskT = (jnp.transpose(bias_mat.astype(jnp.float32)) > -1e8).astype(jnp.int8)

    # Pad the node dim to a multiple of 128 so the tiled, streamed path is
    # always used.  Padded nodes get a self-loop (finite softmax denominator)
    # and contribute exactly zero to real nodes.
    Np = ((N + 127) // 128) * 128
    pad = Np - N
    if pad:
        x = jnp.pad(x, ((0, 0), (0, 0), (0, pad)))
        maskT = jnp.pad(maskT, ((0, pad), (0, pad)))
        pad_diag = (jnp.arange(Np) >= N).astype(jnp.int8)
        maskT = jnp.maximum(maskT, jnp.diag(pad_diag))

    # Budget-driven tile size / vmem limit from the actual chip's VMEM.
    cap = _vmem_capacity_bytes()
    budget = int(0.70 * cap)
    fixed = (2 * C * Np * 4              # x block (double-buffered)
             + 2 * F * Np * 4            # resident output block buffers
             + 2 * F * max(C, 128) * 4   # w1
             + 2 * max(C, 8) * 128 * 4   # aw column
             + 8 * Np * 4 + 8 * 128 * 4)  # scratch rows
    per_tj = 18 * Np + 8 * F             # int8 mask dbuf + f32 temporaries/row
    if tj is None:
        tj_cap = max((budget - fixed) // max(per_tj, 1), 128)
        cands = [t for t in range(128, Np + 1, 128)
                 if Np % t == 0 and t <= tj_cap]
        tj = max(cands) if cands else 128
    assert Np % tj == 0 and tj % 128 == 0, (N, Np, tj)
    nj = Np // tj

    # When the batch provides no parallelism, split the j reduction across two
    # cores (v7x megacore); partials are summed in the wrapper (F*N*4 bytes).
    ncores = 2 if (B == 1 and nj >= 2 and nj % 2 == 0) else 1
    nj_per_core = nj // ncores

    need = fixed + per_tj * tj
    vmem_limit = int(min(max(need + need // 2, 32 * 1024 * 1024),
                         int(0.90 * cap)))

    kernel = functools.partial(_attn_head_kernel, tj=tj,
                               nj_per_core=nj_per_core)

    partial = pl.pallas_call(
        kernel,
        out_shape=jax.ShapeDtypeStruct((ncores, B, F, Np), jnp.float32),
        grid_spec=pltpu.PrefetchScalarGridSpec(
            num_scalar_prefetch=0,
            grid=(ncores, B, nj_per_core),
            in_specs=[
                pl.BlockSpec((pl.Squeezed(), C, Np), lambda c, b, j: (b, 0, 0)),
                pl.BlockSpec((F, C), lambda c, b, j: (0, 0)),
                pl.BlockSpec((C, 1), lambda c, b, j: (0, 0)),
                # NOTE: if the (now int8) mask DMA ever becomes latency-bound
                # at small tj, add pipeline_mode=pl.Buffered(3) here.
                pl.BlockSpec((tj, Np),
                             lambda c, b, j: (c * nj_per_core + j, 0)),
            ],
            out_specs=pl.BlockSpec((pl.Squeezed(), pl.Squeezed(), F, Np),
                                   lambda c, b, j: (c, b, 0, 0)),
            scratch_shapes=[
                pltpu.VMEM((1, Np), jnp.float32),   # f row
                pltpu.VMEM((1, 1), jnp.float32),    # per-batch softmax shift
            ],
        ),
        compiler_params=pltpu.CompilerParams(
            # j is a reduction axis into the resident output accumulator ->
            # "arbitrary"; core-split and batch axes are megacore-parallel.
            dimension_semantics=("parallel", "parallel", "arbitrary"),
            vmem_limit_bytes=vmem_limit,
        ),
    )(x, w1, aw_col, maskT)

    raw = partial[0] if ncores == 1 else jnp.sum(partial, axis=0)
    out = jnp.where(raw > 0, raw, jnp.expm1(jnp.minimum(raw, 0.0)))   # ELU
    return out[..., :N] if pad else out


# ----------------------------------------------------------------------------
# Pure-JAX reference mirroring the PyTorch Attn_head forward (f32)
# ----------------------------------------------------------------------------
def attn_head_ref(x, w1, a1, bias_mat):
    seq_fts = jnp.einsum("fc,bcn->bfn", w1, x)              # conv1
    f1 = jnp.einsum("of,bfn->bon", a1, seq_fts)             # conv2_1 -> (B,1,N)
    logits = f1 + jnp.transpose(f1, (0, 2, 1))              # conv2_1 reused
    logits = jnp.where(logits > 0, logits, 0.01 * logits)   # LeakyReLU
    coefs = jax.nn.softmax(logits + bias_mat[None], axis=1)
    ret = jnp.einsum("bij,bfj->bif", coefs, seq_fts)
    ret = jnp.transpose(ret, (0, 2, 1))                     # (B,F,N)
    return jnp.where(ret > 0, ret, jnp.expm1(jnp.minimum(ret, 0.0)))  # ELU


# ----------------------------------------------------------------------------
# Full HeteGAT_multi forward: Pallas attn_head per metapath + plain-JAX
# SimpleAttLayer and fc (thin glue, not worth separate kernels).
# ----------------------------------------------------------------------------
def hete_gat_multi_forward(inputs_list, bias_mat_list, attn_params,
                           simple_att_params, fc_params, n_heads, *, tj=None):
    w_omega, b_omega, u_omega = simple_att_params
    fc_w, fc_b = fc_params
    embed_list = []
    for x_i, bias_i, (w1, a1) in zip(inputs_list, bias_mat_list, attn_params):
        # The module reuses the SAME layer (weights) for every head of a
        # metapath and dropout is 0 -> heads are identical: compute once.
        head = attn_head(x_i, w1, a1, bias_i, tj=tj)          # (1, hid, N)
        h1 = jnp.concatenate([head] * n_heads[0], axis=1)     # (1, heads*hid, N)
        # Reproduce torch.squeeze(h_1).reshape(N, 1, -1) exactly (raw reshape,
        # not a transpose); requires batch == 1, as in the original module.
        emb = jnp.reshape(jnp.squeeze(h1), (h1.shape[-1], 1, -1))  # (N, 1, D)
        embed_list.append(emb)
    multi_embed = jnp.concatenate(embed_list, axis=1)         # (N, P, D)
    # SimpleAttLayer (return_alphas=True branch)
    v = jnp.tanh(multi_embed @ w_omega + b_omega)             # (N, P, A)
    vu = v @ u_omega                                          # (N, P, 1)
    alphas = jax.nn.softmax(vu, axis=1)
    final_embed = jnp.sum(
        multi_embed * alphas.reshape(alphas.shape[0], -1, 1), axis=1)  # (N, D)
    return final_embed @ fc_w.T + fc_b                        # (N, nb_classes)


if __name__ == "__main__":
    key = jax.random.PRNGKey(0)

    # ---- 1) Attn_head kernel vs. reference (B=2, auto tj, no core split) ----
    B, C, N, F = 2, 16, 256, 32
    kx, kw1, ka1, kadj, key = jax.random.split(key, 5)
    x = jax.random.normal(kx, (B, C, N), dtype=jnp.float32)
    w1 = jax.random.normal(kw1, (F, C), dtype=jnp.float32) * (1.0 / jnp.sqrt(C))
    a1 = jax.random.normal(ka1, (1, F), dtype=jnp.float32) * (1.0 / jnp.sqrt(F))
    adj = jnp.logical_or(jax.random.bernoulli(kadj, 0.5, (N, N)),
                         jnp.eye(N, dtype=bool))
    bias_mat = jnp.where(adj, 0.0, -1e9).astype(jnp.float32)

    out = jax.block_until_ready(attn_head(x, w1, a1, bias_mat))
    ref = attn_head_ref(x, w1, a1, bias_mat)
    assert out.shape == (B, F, N)
    assert bool(jnp.allclose(out, ref, atol=5e-3, rtol=5e-3)), \
        float(jnp.max(jnp.abs(out - ref)))

    # ---- 2) Padded N (200 -> 256) + explicit tj=128 -> 2-way j/core split ---
    B2, C2, N2, F2 = 1, 8, 200, 16
    kx2, kw2, ka2, kadj2, key = jax.random.split(key, 5)
    x2 = jax.random.normal(kx2, (B2, C2, N2), dtype=jnp.float32)
    w12 = jax.random.normal(kw2, (F2, C2), jnp.float32) * (1.0 / jnp.sqrt(C2))
    a12 = jax.random.normal(ka2, (1, F2), jnp.float32) * (1.0 / jnp.sqrt(F2))
    adj2 = jnp.logical_or(jax.random.bernoulli(kadj2, 0.4, (N2, N2)),
                          jnp.eye(N2, dtype=bool))
    bias2 = jnp.where(adj2, 0.0, -1e9).astype(jnp.float32)

    out2 = jax.block_until_ready(attn_head(x2, w12, a12, bias2, tj=128))
    ref2 = attn_head_ref(x2, w12, a12, bias2)
    assert out2.shape == (B2, F2, N2)
    assert bool(jnp.allclose(out2, ref2, atol=5e-3, rtol=5e-3)), \
        float(jnp.max(jnp.abs(out2 - ref2)))

    # ---- 3) Full HeteGAT_multi forward --------------------------------------
    P, hid, n_heads, nb_classes, att_size = 2, 32, [2, 1], 3, 128
    d_embed = n_heads[0] * hid            # 64, as hard-coded in the module
    c_list = [16, 32]
    inputs_list, bias_list, attn_params = [], [], []
    for ci in c_list:
        k1, k2, k3, k4, key = jax.random.split(key, 5)
        inputs_list.append(jax.random.normal(k1, (1, ci, N), dtype=jnp.float32))
        adj_i = jnp.logical_or(jax.random.bernoulli(k4, 0.3, (N, N)),
                               jnp.eye(N, dtype=bool))
        bias_list.append(jnp.where(adj_i, 0.0, -1e9).astype(jnp.float32))
        attn_params.append(
            (jax.random.normal(k2, (hid, ci), jnp.float32) / jnp.sqrt(ci),
             jax.random.normal(k3, (1, hid), jnp.float32) / jnp.sqrt(hid)))
    k1, k2, k3, key = jax.random.split(key, 4)
    w_omega = jax.random.normal(k1, (d_embed, att_size), jnp.float32) / jnp.sqrt(d_embed)
    b_omega = jnp.zeros((att_size,), jnp.float32)
    u_omega = jax.random.normal(k2, (att_size, 1), jnp.float32) / jnp.sqrt(att_size)
    fc_w = jax.random.normal(k3, (nb_classes, d_embed), jnp.float32) / jnp.sqrt(d_embed)
    fc_b = jnp.zeros((nb_classes,), jnp.float32)

    logits_out = jax.block_until_ready(
        hete_gat_multi_forward(inputs_list, bias_list, attn_params,
                               (w_omega, b_omega, u_omega), (fc_w, fc_b),
                               n_heads, tj=128))
    assert logits_out.shape == (N, nb_classes)
    assert bool(jnp.all(jnp.isfinite(logits_out)))

    print("KERNEL_OK")
</pallas_src>

<mosaic_0001>
module attributes {stable_mosaic.version = 11 : i64} {
  func.func @_attn_head_kernel(%arg0: i32, %arg1: i32, %arg2: i32, %arg3: memref<1x16x256xf32, #tpu.memory_space<vmem>>, %arg4: memref<32x16xf32, #tpu.memory_space<vmem>>, %arg5: memref<16x1xf32, #tpu.memory_space<vmem>>, %arg6: memref<256x256xi8, #tpu.memory_space<vmem>>, %arg7: memref<1x1x32x256xf32, #tpu.memory_space<vmem>>, %arg8: memref<1x256xf32, #tpu.memory_space<vmem>>, %arg9: memref<1x1xf32, #tpu.memory_space<vmem>>) attributes {dimension_semantics = [#tpu.dimension_semantics<parallel>, #tpu.dimension_semantics<parallel>, #tpu.dimension_semantics<arbitrary>], iteration_bounds = array<i64: 1, 2, 1>, scalar_prefetch = 0 : i64, scratch_operands = 2 : i64, tpu.core_type = #tpu.core_type<tc>, window_params = [{transform_indices = @transform_0, window_bounds = array<i64: 1, 16, 256>}, {pipeline_mode = #tpu.pipeline_mode<synchronous>, transform_indices = @transform_1, window_bounds = array<i64: 32, 16>}, {pipeline_mode = #tpu.pipeline_mode<synchronous>, transform_indices = @transform_2, window_bounds = array<i64: 16, 1>}, {transform_indices = @transform_3, window_bounds = array<i64: 256, 256>}, {transform_indices = @transform_4, window_bounds = array<i64: 1, 1, 32, 256>}]} {
    %c0_i32 = arith.constant 0 : i32
    %0 = arith.cmpi eq, %arg2, %c0_i32 : i32
    %1 = arith.extui %0 : i1 to i32
    %c0_i32_0 = arith.constant 0 : i32
    %2 = arith.cmpi ne, %1, %c0_i32_0 : i32
    scf.if %2 {
      %c0_23 = arith.constant 0 : index
      %c0_24 = arith.constant 0 : index
      %c0_25 = arith.constant 0 : index
      %47 = vector.load %arg3[%c0_23, %c0_24, %c0_25] : memref<1x16x256xf32, #tpu.memory_space<vmem>>, vector<1x16x256xf32>
      %48 = vector.shape_cast %47 : vector<1x16x256xf32> to vector<16x256xf32>
      %c0_26 = arith.constant 0 : index
      %c0_27 = arith.constant 0 : index
      %49 = vector.load %arg5[%c0_26, %c0_27] : memref<16x1xf32, #tpu.memory_space<vmem>>, vector<16x1xf32>
      %50 = vector.broadcast %49 : vector<16x1xf32> to vector<16x256xf32>
      %51 = arith.mulf %48, %50 : vector<16x256xf32>
      %cst_28 = arith.constant dense<0.000000e+00> : vector<256xf32>
      %52 = vector.multi_reduction <add>, %51, %cst_28 [0] : vector<16x256xf32> to vector<256xf32>
      %53 = vector.shape_cast %52 : vector<256xf32> to vector<1x256xf32>
      %c0_29 = arith.constant 0 : index
      %c0_30 = arith.constant 0 : index
      %54 = vector.load %arg8[%c0_29, %c0_30] : memref<1x256xf32, #tpu.memory_space<vmem>>, vector<1x256xf32>
      tpu.vector_store %arg8[%c0_29, %c0_30], %53 {strides = array<i32>} : memref<1x256xf32, #tpu.memory_space<vmem>>, vector<1x256xf32>,
      %cst_31 = arith.constant dense<0xFF800000> : vector<1xf32>
      %55 = vector.multi_reduction <maximumf>, %53, %cst_31 [1] : vector<1x256xf32> to vector<1xf32>
      %56 = vector.shape_cast %55 : vector<1xf32> to vector<1x1xf32>
      %c0_32 = arith.constant 0 : index
      %c0_33 = arith.constant 0 : index
      %57 = vector.load %arg9[%c0_32, %c0_33] : memref<1x1xf32, #tpu.memory_space<vmem>>, vector<1x1xf32>
      tpu.vector_store %arg9[%c0_32, %c0_33], %56 {strides = array<i32>} : memref<1x1xf32, #tpu.memory_space<vmem>>, vector<1x1xf32>,
      %cst_34 = arith.constant 0.000000e+00 : f32
      %58 = vector.broadcast %cst_34 : f32 to vector<32x256xf32>
      %c0_35 = arith.constant 0 : index
      %c0_36 = arith.constant 0 : index
      %c0_37 = arith.constant 0 : index
      %c0_38 = arith.constant 0 : index
      %59 = vector.load %arg7[%c0_35, %c0_36, %c0_37, %c0_38] : memref<1x1x32x256xf32, #tpu.memory_space<vmem>>, vector<1x1x32x256xf32>
      %60 = vector.shape_cast %59 : vector<1x1x32x256xf32> to vector<32x256xf32>
      %61 = vector.shape_cast %58 : vector<32x256xf32> to vector<1x1x32x256xf32>
      tpu.vector_store %arg7[%c0_35, %c0_36, %c0_37, %c0_38], %61 {strides = array<i32>} : memref<1x1x32x256xf32, #tpu.memory_space<vmem>>, vector<1x1x32x256xf32>,
    } else {
    }
    %c1_i32 = arith.constant 1 : i32
    %3 = arith.muli %arg0, %c1_i32 : i32
    %4 = arith.addi %3, %arg2 : i32
    %c256_i32 = arith.constant 256 : i32
    %5 = arith.muli %4, %c256_i32 : i32
    %6 = tpu.assume_multiple %5, 128 : i32
    %c0 = arith.constant 0 : index
    %c0_1 = arith.constant 0 : index
    %7 = arith.index_cast %6 : i32 to index
    %8 = vector.load %arg3[%c0, %c0_1, %7] : memref<1x16x256xf32, #tpu.memory_space<vmem>>, vector<1x16x256xf32>
    %9 = vector.shape_cast %8 : vector<1x16x256xf32> to vector<16x256xf32>
    %c0_2 = arith.constant 0 : index
    %c0_3 = arith.constant 0 : index
    %10 = vector.load %arg4[%c0_2, %c0_3] : memref<32x16xf32, #tpu.memory_space<vmem>>, vector<32x16xf32>
    %cst = arith.constant dense<0.000000e+00> : vector<32x256xf32>
    %11 = tpu.matmul %10, %9, %cst {dimension_numbers = #tpu.dot_dimension_numbers<[1], [0], [0], [1], [0, 0, 1, 1], [], []>} : vector<32x16xf32>, vector<16x256xf32>, vector<32x256xf32> -> vector<32x256xf32>
    %c0_4 = arith.constant 0 : index
    %c0_5 = arith.constant 0 : index
    %12 = vector.load %arg8[%c0_4, %c0_5] : memref<1x256xf32, #tpu.memory_space<vmem>>, vector<1x256xf32>
    %c0_6 = arith.constant 0 : index
    %13 = arith.index_cast %6 : i32 to index
    %14 = vector.load %arg8[%c0_6, %13] : memref<1x256xf32, #tpu.memory_space<vmem>>, vector<1x256xf32>
    %15 = tpu.transpose %14, [1, 0] : vector<1x256xf32> -> vector<256x1xf32>
    %16 = vector.broadcast %15 : vector<256x1xf32> to vector<256x256xf32>
    %17 = vector.broadcast %12 : vector<1x256xf32> to vector<256x256xf32>
    %18 = arith.addf %16, %17 : vector<256x256xf32>
    %cst_7 = arith.constant 0.00999999977 : f32
    %19 = vector.broadcast %cst_7 : f32 to vector<256x256xf32>
    %20 = arith.mulf %19, %18 : vector<256x256xf32>
    %21 = arith.maximumf %18, %20 : vector<256x256xf32>
    %c0_8 = arith.constant 0 : index
    %c0_9 = arith.constant 0 : index
    %22 = vector.load %arg9[%c0_8, %c0_9] : memref<1x1xf32, #tpu.memory_space<vmem>>, vector<1x1xf32>
    %23 = vector.broadcast %22 : vector<1x1xf32> to vector<256x1xf32>
    %24 = arith.addf %15, %23 : vector<256x1xf32>
    %cst_10 = arith.constant 0.00999999977 : f32
    %25 = vector.broadcast %cst_10 : f32 to vector<256x1xf32>
    %26 = arith.mulf %25, %24 : vector<256x1xf32>
    %27 = arith.maximumf %24, %26 : vector<256x1xf32>
    %28 = vector.broadcast %27 : vector<256x1xf32> to vector<256x256xf32>
    %29 = arith.subf %21, %28 : vector<256x256xf32>
    %30 = math.exp %29 : vector<256x256xf32>
    %c0_11 = arith.constant 0 : index
    %c0_12 = arith.constant 0 : index
    %31 = vector.load %arg6[%c0_11, %c0_12] : memref<256x256xi8, #tpu.memory_space<vmem>>, vector<256x256xi8>
    %32 = arith.sitofp %31 : vector<256x256xi8> to vector<256x256xf32>
    %33 = arith.mulf %30, %32 : vector<256x256xf32>
    %cst_13 = arith.constant dense<0.000000e+00> : vector<256xf32>
    %34 = vector.multi_reduction <add>, %33, %cst_13 [1] : vector<256x256xf32> to vector<256xf32>
    %35 = vector.shape_cast %34 : vector<256xf32> to vector<256x1xf32>
    %36 = tpu.reciprocal %35 {approx = true} : vector<256x1xf32> -> vector<256x1xf32>
    %37 = tpu.transpose %36, [1, 0] : vector<256x1xf32> -> vector<1x256xf32>
    %38 = vector.broadcast %37 : vector<1x256xf32> to vector<32x256xf32>
    %39 = arith.mulf %11, %38 : vector<32x256xf32>
    %c0_14 = arith.constant 0 : index
    %c0_15 = arith.constant 0 : index
    %c0_16 = arith.constant 0 : index
    %c0_17 = arith.constant 0 : index
    %40 = vector.load %arg7[%c0_14, %c0_15, %c0_16, %c0_17] : memref<1x1x32x256xf32, #tpu.memory_space<vmem>>, vector<1x1x32x256xf32>
    %41 = vector.shape_cast %40 : vector<1x1x32x256xf32> to vector<32x256xf32>
    %cst_18 = arith.constant dense<0.000000e+00> : vector<32x256xf32>
    %42 = tpu.matmul %39, %33, %cst_18 {dimension_numbers = #tpu.dot_dimension_numbers<[1], [0], [0], [1], [0, 0, 1, 1], [], []>} : vector<32x256xf32>, vector<256x256xf32>, vector<32x256xf32> -> vector<32x256xf32>
    %43 = arith.addf %41, %42 : vector<32x256xf32>
    %c0_19 = arith.constant 0 : index
    %c0_20 = arith.constant 0 : index
    %c0_21 = arith.constant 0 : index
    %c0_22 = arith.constant 0 : index
    %44 = vector.load %arg7[%c0_19, %c0_20, %c0_21, %c0_22] : memref<1x1x32x256xf32, #tpu.memory_space<vmem>>, vector<1x1x32x256xf32>
    %45 = vector.shape_cast %44 : vector<1x1x32x256xf32> to vector<32x256xf32>
    %46 = vector.shape_cast %43 : vector<32x256xf32> to vector<1x1x32x256xf32>
    tpu.vector_store %arg7[%c0_19, %c0_20, %c0_21, %c0_22], %46 {strides = array<i32>} : memref<1x1x32x256xf32, #tpu.memory_space<vmem>>, vector<1x1x32x256xf32>,
    return
  }
  func.func @transform_0(%arg0: i32, %arg1: i32, %arg2: i32) -> (i32, i32, i32) {
    %c0_i32 = arith.constant 0 : i32
    %c0_i32_0 = arith.constant 0 : i32
    %c0_i32_1 = arith.constant 0 : i32
    return %arg1, %c0_i32, %c0_i32_0 : i32, i32, i32
  }
  func.func @transform_1(%arg0: i32, %arg1: i32, %arg2: i32) -> (i32, i32) {
    %c0_i32 = arith.constant 0 : i32
    %c0_i32_0 = arith.constant 0 : i32
    %c0_i32_1 = arith.constant 0 : i32
    return %c0_i32, %c0_i32_0 : i32, i32
  }
  func.func @transform_2(%arg0: i32, %arg1: i32, %arg2: i32) -> (i32, i32) {
    %c0_i32 = arith.constant 0 : i32
    %c0_i32_0 = arith.constant 0 : i32
    %c0_i32_1 = arith.constant 0 : i32
    return %c0_i32, %c0_i32_0 : i32, i32
  }
  func.func @transform_3(%arg0: i32, %arg1: i32, %arg2: i32) -> (i32, i32) {
    %c1_i32 = arith.constant 1 : i32
    %0 = arith.muli %arg0, %c1_i32 : i32
    %1 = arith.addi %0, %arg2 : i32
    %c0_i32 = arith.constant 0 : i32
    %c0_i32_0 = arith.constant 0 : i32
    return %1, %c0_i32 : i32, i32
  }
  func.func @transform_4(%arg0: i32, %arg1: i32, %arg2: i32) -> (i32, i32, i32, i32) {
    %c0_i32 = arith.constant 0 : i32
    %c0_i32_0 = arith.constant 0 : i32
    %c0_i32_1 = arith.constant 0 : i32
    return %arg0, %arg1, %c0_i32, %c0_i32_0 : i32, i32, i32, i32
  }
}

</mosaic_0001>

<bundles_post_ra>
// kernel: tpu_custom_call.1
= control target key start
LH: loop header
LB: loop body
LE: loop exit
PB: predicated region body
PF: predicated region fallthrough
CT: control target
= control target key end

     0   :  { %9 = vsyncpa [#allocation5], 0  ;;  %s3808_s0 = inlined_call_operand.vmem [shape: f32[2,16,256], index: 0, kind: input, shape index: {}]   ;;  %s3809_s1 = inlined_call_operand.vmem [shape: f32[32,16], index: 1, kind: input, shape index: {}]   ;;  %s3810_s2 = inlined_call_operand.vmem [shape: f32[16,1], index: 2, kind: input, shape index: {}]   ;;  %s3811_s3 = inlined_call_operand.hbm [shape: s8[256,256], index: 3, kind: input, shape index: {}]   ;;  %s3812_s4 = inlined_call_operand.hbm [shape: f32[1,2,32,256], index: 4, kind: output, shape index: {}]  }
   0x1   :  { %10 = vsyncpa [#allocation6], 0 }
   0x2   :  { %12 = vsyncpa [#allocation6 + $0x1], 0  ;;  %s2468_s15 = smov 0   ;;  %s2470_s16 = smov 0  }
   0x3   :  { %s2472_s17 = smov 0   ;;  %s2474_s18 = smov 0  }
   0x4   :  { %s2476_s19 = smov 0   ;;  %s2478_s20 = smov 0  }
   0x5 LB: > { %s1971_s21 = sadd.s32 4294967295, %s2432_s20   ;;  %s1972_s22 = sadd.s32 4294967294, %s2432_s20   ;;  %s2432_s20 = sphi %s2478_s20, %s18_s20   ;;  %s2428_s19 = sphi %s2476_s19, %s4018_s19   ;;  %s2424_s18 = sphi %s2474_s18, %s4017_s18   ;;  %s2420_s17 = sphi %s2472_s17, %s4016_s17   ;;  %s2416_s16 = sphi %s2470_s16, %s4015_s16   ;;  %s2412_s15 = sphi %s2468_s15, %s4014_s15  }
   0x6   : > { %s33_s23 = sadd.s32 1, %s2428_s19  ;;  %s142_s24 = sadd.s32 1, %s2420_s17 }
   0x7   : > { %p35_p0 = scmp.ge.s32.totalorder %s33_s23, 2  ;;  %p152_p1 = scmp.ne.s32.totalorder %s2420_s17, %s2416_s16 }
   0x8   : > { %p153_p2 = scmp.eq.s32.totalorder %s1971_s21, 1  ;;  %p158_p3 = scmp.ne.s32.totalorder %s2416_s16, %s2412_s15 }
   0x9   : > { %s4020_s23 = smov (%p35_p0, %s33_s23), 0  ;;  %p159_p5 = scmp.eq.s32.totalorder %s1972_s22, 1 }
   0xa   : > { %p2508_p4 = por %p153_p2, %p152_p1  ;;  %s138_s26 = ssub.s32 %s2428_s19, %s4020_s23 }
   0xb   : > { %p1973_p6 = scmp.ge.s32.totalorder %s2432_s20, 1  ;;  %p140_p7 = scmp.eq.s32.totalorder %s138_s26, 0 }
   0xc   : > { %p2515_p8 = por %p159_p5, %p158_p3  ;;  %p166_p9 = scmp.lt.s32.totalorder %s2432_s20, 3 }
   0xd   : > { %s2521_s28 = scalar_select %p140_p7, %s2420_s17, %s142_s24  }
   0xe   : > { %p2523_p10 = pnand %p1973_p6, %p166_p9  ;;  %p2527_p11 = scmp.eq.s32.totalorder %s1971_s21, 0 }
   0xf   : > { %s2434_s5 = smov [#allocation4]  }
  0x10   : > { %p2063_p12 = pneg %p2523_p10  ;;  %s189_s6 = sshll.u32 %s2434_s5, 4  ;;  %s190_s6 = int_to_ptr.vmem [resolvable:$true] %s189_s6 }
  0x11   : > { %s2337_s7 = scalar_lea.vmem %s190_s6, 2048  ;;  %p2345_p5 = scmp.lt.s32.totalorder %s190_s6, %s190_s6 }
  0x12   : > { %p2064_p13 = pnand %p2527_p11, %p2063_p12  ;;  %p2338_p1 = scmp.ne.s32.totalorder %s190_s6, %s2337_s7 }
  0x13   : > { %p2346_p6 = scmp.lt.s32.totalorder %s2337_s7, %s2337_s7 }
  0x14   : > { %p2328_p0 = pneg %p2064_p13 }
  0x15   : > { %p2347_p7 = por %p2346_p6, %p2345_p5 }
  0x16   : > { %p2340_p2 = pnand %p2338_p1, %p2328_p0 }
  0x18   : > { %p2341_p3 = pneg %p2340_p2 }
  0x1a   : > { %p2348_p9 = pnand %p2347_p7, %p2341_p3 }
  0x1c   : > { %2351 = shalt.err (!%p2348_p9)
}
  0x1d   : > { %s2435_s8 = smov 256   ;;  %s2436_s9 = smov 16  }
  0x1e   : > { %2066 = dma.hbm_to_vmem [thread:$0]  (!%p2064_p13), %s3811_s3, 2048, %s190_s6, [#allocation5], %s2435_s8, %s2435_s8, %s2436_s9  }
  0x1f   : > { %213 = sbr.rel (%p2523_p10) target bundleno = 1078 (0x436), region = 36 }
  0x24   : > { %2403 = dma.done.wait (%p2527_p11), [#allocation5], 2048  }
  0x25   : > { %2405 = vsyncadd (%p2527_p11), [#allocation5], 4294965248  ;;  %v2437_v0 = vmov 0   ;;  %v254_v1 = vld [vmem:[%s3810_s2] sm:$0xff]  ;;  %v255_v2 = vld [vmem:[%s3810_s2 + $0x8] sm:$0xff]  ;;  %p239_p10 = scmp.lt.s32.totalorder %s2424_s18, 1  ;;  %v290_v21 = vlaneseq }
  0x26   : > { %2130 = vset.pattern.permute.xlu0 %v2437_v0  ;;  %v2438_v19 = vmov 1966171168   ;;  %vm310_vm1 = vcmask 0   ;;  %vm334_vm2 = vcmask 130048   ;;  %s236_s13 = sand.u32 1, %s2416_s16  }
  0x27   : > { %258 = vperm.xlu0 %2130, %v254_v1   ;;  %s240_s22 = scalar_select %p239_p10, %s2424_s18, 1  ;;  %v288_v20 = vunpack.c.l.s4 %v2438_v19  ;;  %v2561_v27 = vshrl.u32 %v290_v21, 7  ;;  %vm304_vm0 = vcmp.lt.s32.totalorder %v290_v21, 256 }
  0x28   : > { %s1978_s14 = sshll.u32 %s236_s13, 6  ;;  %s3763_s5 = scalar_lea.sflag [#allocation6], %s236_s13 }
  0x29   : > { %s1991_s24 = sshll.u32 %s240_s22, 5  ;;  %v289_v26 = vunpack.c.0.s8 %v288_v20  ;;  %v446_v37 = vsub.s32 1, %v2561_v27  ;;  %v2568_v40 = vsub.s32 0, %v2561_v27  ;;  %s238_s21 = scalar_lea.vmem [#allocation7], %s1978_s14 }
  0x2a   : > { %s2555_s30 = scalar_lea.vmem %s3808_s0, %s1991_s24  ;;  %s1992_s22 = sshll.u32 %s2424_s18, 10 }
  0x2b   : > { %263 = vperm.xlu0 %2130, %v255_v2   ;;  %v250_v4 = vld [vmem:[%s2555_s30] sm:$0xff]  ;;  %v251_v5 = vld [vmem:[%s2555_s30 + $0x8] sm:$0xff]  ;;  %v252_v6 = vld [vmem:[%s2555_s30 + $0x10] sm:$0xff]  ;;  %v292_v32 = vsub.s32 %v289_v26, %v2561_v27  ;;  %3875 = vst [vmem:[#allocation10_spill] sm:$0xff] %v2568_v40  ;;  %s1877_s24 = sshll.u32 %s238_s21, 4  ;;  %s2440_s18 = smov [#allocation7]   ;;  %s3761_s24 = int_to_ptr.vmem [resolvable:$true] %s1877_s24 }
  0x2c   : > { %v253_v7 = vld [vmem:[%s2555_s30 + $0x18] sm:$0xff]  ;;  %s2352_s6 = scalar_lea.vmem %s3761_s24, 1024  ;;  %s2356_s7 = sshll.u32 %s2440_s18, 4  ;;  %s2357_s7 = int_to_ptr.vmem [resolvable:$false] %s2356_s7 }
  0x2d   : > { %p2353_p11 = scmp.ne.s32.totalorder %s3761_s24, %s2352_s6  ;;  %s2358_s8 = scalar_lea.vmem %s2357_s7, 2048 }
  0x2e   : > { %p2359_p0 = scmp.lt.s32.totalorder %s3761_s24, %s2357_s7  ;;  %p2360_p1 = scmp.lt.s32.totalorder %s2358_s8, %s2352_s6 }
  0x2f   : > { %p2354_p12 = pnand %p2353_p11, %p2508_p4 }
  0x30   : > { %p2361_p2 = por %p2360_p1, %p2359_p0 }
  0x31   : > { %p2355_p13 = pneg %p2354_p12 }
  0x33   : > { %p2362_p3 = pnand %p2361_p2, %p2355_p13 }
  0xa2   : > { %v259_v3 = vpop.permute.xlu0 %258 }
  0xa3   : > { %v266_v9 = vmul.f32 %v259_v3, %v250_v4  ;;  %v267_v10 = vmul.f32 %v259_v3, %v251_v5 }
  0xa6   : > { %v264_v8 = vpop.permute.xlu0 %263 }
  0xa7   : > { %v268_v11 = vmul.f32 %v264_v8, %v252_v6  ;;  %v269_v12 = vmul.f32 %v264_v8, %v253_v7 }
  0xa9   : > { %v270_v13 = vadd.f32 %v268_v11, %v266_v9  ;;  %v277_v14 = vadd.f32 %v269_v12, %v267_v10 }
  0xab   : > { %v271_v15 = vrot.slane %v270_v13, 4  ;;  %v278_v16 = vrot.slane %v277_v14, 4 }
  0xad   : > { %v272_v17 = vadd.f32 %v271_v15, %v270_v13  ;;  %v279_v18 = vadd.f32 %v278_v16, %v277_v14 }
  0xaf   : > { %v273_v22 = vrot.slane %v272_v17, 2  ;;  %v280_v23 = vrot.slane %v279_v18, 2 }
  0xb1   : > { %v274_v24 = vadd.f32 %v273_v22, %v272_v17  ;;  %v281_v25 = vadd.f32 %v280_v23, %v279_v18 }
  0xb3   : > { %v275_v28 = vrot.slane %v274_v24, 1  ;;  %v282_v29 = vrot.slane %v281_v25, 1 }
  0xb5   : > { %v276_v30 = vadd.f32 %v275_v28, %v274_v24  ;;  %v283_v31 = vadd.f32 %v282_v29, %v281_v25 }
  0xb7   : > { %v307_v33 = vmax.f32 %v276_v30, %v283_v31  ;;  %v286_v34 = vcombine.low %v276_v30, %v283_v31 }
  0xb9   : > { %308 = vmax.xlane.f32.xlu1 %v307_v33  ;;  %v293_v35 = vrot.slane %v286_v34, %v292_v32 }
  0xbb   : > { %v300_v36 = vrot.slane %v293_v35, %v292_v32 }
  0xbd   : > { %306 = vst.msk [vmem:[#allocation2] sm:$0x3] %vm304_vm0, %v300_v36 }
  0xc4   : > { %v438_v38 = vld [vmem:[#allocation2] sm:$0x3] }
  0xc5   : > { %v447_v39 = vrot.slane %v438_v38, %v446_v37  ;;  %v443_v41 = vrot.slane %v438_v38, %v2568_v40 }
  0xc7   : > { %482 = vxpose.xlu0.b32.start.end [1/1] (short) %v447_v39, 128 }
  0xec   : > { %450 = vxpose.xlu1.b32.start.end [1/1] (short) %v443_v41, 128 }
 0x10a   : > { %2131 = vset.pattern.permute.xlu1 %v2437_v0 }
 0x142   : > { %v309_v42 = vpop.xlane.xlu1 %308 }
 0x143   : > { %311 = vst.msk [vmem:[#allocation3] sm:$0x1] %vm310_vm1, %v309_v42  ;;  %v498_v43 = vpop.trf.xlu0 }
 0x146   : > { %596 = vperm.xlu1 %2131, %v498_v43  }
 0x147   : > { %v499_v44 = vpop.trf.xlu0 }
 0x14a   : > { %v2571_v48 = vld [vmem:[#allocation3] ss:$0 sm:$0xff] }
 0x14b   : > { %v500_v45 = vpop.trf.xlu0  ;;  %v900_v50 = vadd.f32 %v2571_v48, %v498_v43  ;;  %v901_v55 = vadd.f32 %v2571_v48, %v499_v44 }
 0x14c   : > { %606 = vperm.xlu1 %2131, %v500_v45   ;;  %v902_v63 = vadd.f32 %v2571_v48, %v500_v45 }
 0x14d   : > { %v932_v52 = vmul.f32 0.01, %v900_v50  ;;  %v933_v59 = vmul.f32 0.01, %v901_v55 }
 0x14e   : > { %v934_v3 = vmul.f32 0.01, %v902_v63 }
 0x14f   : > { %v501_v46 = vpop.trf.xlu0  ;;  %v964_v57 = vmax.f32 %v900_v50, %v932_v52  ;;  %v965_v1 = vmax.f32 %v901_v55, %v933_v59 }
 0x150   : > { %611 = vperm.xlu1 %2131, %v501_v46   ;;  %v903_v7 = vadd.f32 %v2571_v48, %v501_v46  ;;  %v966_v9 = vmax.f32 %v902_v63, %v934_v3 }
 0x152   : > { %v935_v11 = vmul.f32 0.01, %v903_v7 }
 0x153   : > { %v502_v58 = vpop.trf.xlu0 }
 0x154   : > { %v904_v15 = vadd.f32 %v2571_v48, %v502_v58  ;;  %v967_v17 = vmax.f32 %v903_v7, %v935_v11 }
 0x156   : > { %v936_v19 = vmul.f32 0.01, %v904_v15 }
 0x157   : > { %v503_v2 = vpop.trf.xlu0 }
 0x158   : > { %v905_v23 = vadd.f32 %v2571_v48, %v503_v2  ;;  %v968_v25 = vmax.f32 %v904_v15, %v936_v19 }
 0x15a   : > { %v937_v28 = vmul.f32 0.01, %v905_v23 }
 0x15b   : > { %v504_v10 = vpop.trf.xlu0 }
 0x15c   : > { %v906_v32 = vadd.f32 %v2571_v48, %v504_v10  ;;  %v969_v34 = vmax.f32 %v905_v23, %v937_v28  ;;  %v2603_v28 = vld [vmem:[#allocation4 + $0x40] sm:$0xff] }
 0x15e   : > { %v938_v36 = vmul.f32 0.01, %v906_v32 }
 0x15f   : > { %v505_v18 = vpop.trf.xlu0 }
 0x160   : > { %v907_v42 = vadd.f32 %v2571_v48, %v505_v18 }
 0x162   : > { %v939_v46 = vmul.f32 0.01, %v907_v42 }
 0x163   : > { %v506_v26 = vpop.trf.xlu0 }
 0x167   : > { %v507_v35 = vpop.trf.xlu0 }
 0x168   : > { %v466_v47 = vpop.trf.xlu1  ;;  %v909_v59 = vadd.f32 %v2571_v48, %v507_v35 }
 0x169   : > { %516 = vperm.xlu0 %2130, %v466_v47   ;;  %v884_v53 = vadd.f32 %v2571_v48, %v466_v47 }
 0x16a   : > { %v941_v63 = vmul.f32 0.01, %v909_v59 }
 0x16b   : > { %v916_v56 = vmul.f32 0.01, %v884_v53  ;;  %v508_v45 = vpop.trf.xlu0 }
 0x16c   : > { %v467_v49 = vpop.trf.xlu1  ;;  %v910_v3 = vadd.f32 %v2571_v48, %v508_v45 }
 0x16d   : > { %601 = vperm.xlu0 %2130, %v499_v44   ;;  %v885_v60 = vadd.f32 %v2571_v48, %v467_v49  ;;  %v948_v61 = vmax.f32 %v884_v53, %v916_v56  ;;  %v970_v44 = vmax.f32 %v906_v32, %v938_v36  ;;  %v971_v53 = vmax.f32 %v907_v42, %v939_v46  ;;  %v2606_v32 = vld [vmem:[#allocation4 + $0x48] sm:$0xff] }
 0x16e   : > { %v942_v7 = vmul.f32 0.01, %v910_v3  ;;  %v1381_v42 = vunpack.c.0.s8 %v2606_v32 }
 0x16f   : > { %v917_v0 = vmul.f32 0.01, %v885_v60 }
 0x170   : > { %v468_v51 = vpop.trf.xlu1 }
 0x171   : > { %521 = vperm.xlu0 %2130, %v467_v49   ;;  %v886_v4 = vadd.f32 %v2571_v48, %v468_v51  ;;  %v949_v5 = vmax.f32 %v885_v60, %v917_v0 }
 0x173   : > { %v918_v8 = vmul.f32 0.01, %v886_v4 }
 0x174   : > { %v469_v54 = vpop.trf.xlu1 }
 0x175   : > { %526 = vperm.xlu0 %2130, %v468_v51   ;;  %531 = vperm.xlu1 %2131, %v469_v54   ;;  %v887_v12 = vadd.f32 %v2571_v48, %v469_v54  ;;  %v950_v13 = vmax.f32 %v886_v4, %v918_v8  ;;  %v908_v51 = vadd.f32 %v2571_v48, %v506_v26  ;;  %v509_v54 = vpop.trf.xlu0 }
 0x176   : > { %v911_v11 = vadd.f32 %v2571_v48, %v509_v54 }
 0x177   : > { %v919_v16 = vmul.f32 0.01, %v887_v12  ;;  %v940_v55 = vmul.f32 0.01, %v908_v51 }
 0x178   : > { %v470_v62 = vpop.trf.xlu1  ;;  %v943_v15 = vmul.f32 0.01, %v911_v11 }
 0x179   : > { %1062 = vperm.xlu0 %2130, %v964_v57   ;;  %616 = vperm.xlu1 %2131, %v502_v58   ;;  %v888_v20 = vadd.f32 %v2571_v48, %v470_v62  ;;  %v951_v21 = vmax.f32 %v887_v12, %v919_v16 }
 0x17a   : > { %v975_v23 = vmax.f32 %v911_v11, %v943_v15  ;;  %v1387_v11 = vunpack.c.3.s8 %v2606_v32  ;;  %v2664_v15 = vld [vmem:[#allocation4 + $0x18] sm:$0xff] }
 0x17b   : > { %v920_v24 = vmul.f32 0.01, %v888_v20 }
 0x17c   : > { %v471_v6 = vpop.trf.xlu1 }
 0x17d   : > { %982 = vperm.xlu0 %2130, %v948_v61   ;;  %536 = vperm.xlu1 %2131, %v470_v62   ;;  %v889_v29 = vadd.f32 %v2571_v48, %v471_v6  ;;  %v952_v30 = vmax.f32 %v888_v20, %v920_v24  ;;  %v972_v61 = vmax.f32 %v908_v51, %v940_v55  ;;  %v510_v62 = vpop.trf.xlu0 }
 0x17e   : > { %v912_v19 = vadd.f32 %v2571_v48, %v510_v62 }
 0x17f   : > { %v921_v33 = vmul.f32 0.01, %v889_v29 }
 0x180   : > { %v472_v14 = vpop.trf.xlu1 }
 0x181   : > { %1067 = vperm.xlu0 %2130, %v965_v1   ;;  %621 = vperm.xlu1 %2131, %v503_v2   ;;  %v890_v38 = vadd.f32 %v2571_v48, %v472_v14  ;;  %v953_v39 = vmax.f32 %v889_v29, %v921_v33  ;;  %v2608_v33 = vld [vmem:[#allocation4] sm:$0xff] }
 0x183   : > { %v922_v43 = vmul.f32 0.01, %v890_v38 }
 0x184   : > { %v473_v22 = vpop.trf.xlu1 }
 0x185   : > { %987 = vperm.xlu0 %2130, %v949_v5   ;;  %541 = vperm.xlu1 %2131, %v471_v6   ;;  %v891_v47 = vadd.f32 %v2571_v48, %v473_v22  ;;  %v954_v49 = vmax.f32 %v890_v38, %v922_v43  ;;  %v973_v5 = vmax.f32 %v909_v59, %v941_v63  ;;  %v511_v6 = vpop.trf.xlu0  ;;  %v436_v38 = vld [vmem:[#allocation2] sm:$0x3]  ;;  %v1348_v43 = vunpack.c.0.s8 %v2608_v33 }
 0x186   : > { %v2623_v51 = vrot.slane %v436_v38, %v2568_v40  ;;  %v1384_v63 = vunpack.c.2.s8 %v2603_v28 }
 0x187   : > { %v923_v52 = vmul.f32 0.01, %v891_v47  ;;  %v2633_v27 = vcvt.s32.f32 %v1348_v43 }
 0x188   : > { %v474_v31 = vpop.trf.xlu1 }
 0x189   : > { %1072 = vperm.xlu0 %2130, %v966_v9   ;;  %626 = vperm.xlu1 %2131, %v504_v10   ;;  %v892_v56 = vadd.f32 %v2571_v48, %v474_v31  ;;  %v955_v57 = vmax.f32 %v891_v47, %v923_v52 }
 0x18b   : > { %v924_v60 = vmul.f32 0.01, %v892_v56 }
 0x18c   : > { %v475_v41 = vpop.trf.xlu1 }
 0x18d   : > { %992 = vperm.xlu0 %2130, %v950_v13   ;;  %546 = vperm.xlu1 %2131, %v472_v14   ;;  %v893_v0 = vadd.f32 %v2571_v48, %v475_v41  ;;  %v956_v1 = vmax.f32 %v892_v56, %v924_v60  ;;  %v974_v13 = vmax.f32 %v910_v3, %v942_v7  ;;  %v512_v14 = vpop.trf.xlu0  ;;  %v1383_v56 = vunpack.c.1.s8 %v2606_v32 }
 0x18e   : > { %v914_v24 = vadd.f32 %v2571_v48, %v512_v14  ;;  %v1352_v3 = vunpack.c.2.s8 %v2608_v33 }
 0x18f   : > { %v925_v4 = vmul.f32 0.01, %v893_v0 }
 0x190   : > { %v476_v50 = vpop.trf.xlu1 }
 0x191   : > { %1077 = vperm.xlu0 %2130, %v967_v17   ;;  %631 = vperm.xlu1 %2131, %v505_v18   ;;  %v894_v8 = vadd.f32 %v2571_v48, %v476_v50  ;;  %v957_v9 = vmax.f32 %v893_v0, %v925_v4  ;;  %v513_v20 = vpop.trf.xlu0  ;;  %v2647_v4 = vld [vmem:[#allocation4 + $0x50] sm:$0xff] }
 0x193   : > { %v926_v12 = vmul.f32 0.01, %v894_v8 }
 0x194   : > { %v477_v58 = vpop.trf.xlu1 }
 0x195   : > { %997 = vperm.xlu0 %2130, %v951_v21   ;;  %551 = vperm.xlu1 %2131, %v473_v22   ;;  %v895_v16 = vadd.f32 %v2571_v48, %v477_v58  ;;  %v958_v17 = vmax.f32 %v894_v8, %v926_v12  ;;  %v913_v21 = vadd.f32 %v2571_v48, %v511_v6  ;;  %v1354_v12 = vunpack.c.3.s8 %v2608_v33 }
 0x197   : > { %v927_v22 = vmul.f32 0.01, %v895_v16  ;;  %v945_v29 = vmul.f32 0.01, %v913_v21 }
 0x198   : > { %v478_v2 = vpop.trf.xlu1 }
 0x199   : > { %1082 = vperm.xlu0 %2130, %v968_v25   ;;  %636 = vperm.xlu1 %2131, %v506_v26   ;;  %v2601_v25 = vadd.f32 %v2571_v48, %v513_v20  ;;  %v944_v26 = vmul.f32 0.01, %v912_v19 }
 0x19b   : > { %v976_v47 = vmax.f32 %v912_v19, %v944_v26  ;;  %v1388_v19 = vunpack.c.0.s8 %v2647_v4 }
 0x19c   : > { %v479_v10 = vpop.trf.xlu1 }
 0x19d   : > { %1002 = vperm.xlu0 %2130, %v952_v30   ;;  %556 = vperm.xlu1 %2131, %v474_v31   ;;  %v896_v30 = vadd.f32 %v2571_v48, %v478_v2  ;;  %v959_v31 = vmax.f32 %v895_v16, %v927_v22  ;;  %v897_v46 = vadd.f32 %v2571_v48, %v479_v10  ;;  %v2672_v22 = vcvt.s32.f32 %v1352_v3 }
 0x19f   : > { %v929_v60 = vmul.f32 0.01, %v897_v46 }
 0x1a0   : > { %v480_v18 = vpop.trf.xlu1 }
 0x1a1   : > { %1087 = vperm.xlu0 %2130, %v969_v34   ;;  %641 = vperm.xlu1 %2131, %v507_v35   ;;  %v2610_v34 = vld [vmem:[#allocation4 + $0x8] sm:$0xff]  ;;  %v946_v35 = vmul.f32 0.01, %v914_v24 }
 0x1a2   : > { %v1351_v59 = vunpack.c.1.s8 %v2610_v34  ;;  %v1353_v8 = vunpack.c.2.s8 %v2610_v34 }
 0x1a3   : > { %v978_v52 = vmax.f32 %v914_v24, %v946_v35  ;;  %v2688_v35 = vcvt.s32.f32 %v1388_v19  ;;  %v2749_v19 = vld [vmem:[#allocation4 + $0x28] sm:$0xff] }
 0x1a4   : > { %v481_v36 = vpop.trf.xlu1 }
 0x1a5   : > { %1007 = vperm.xlu0 %2130, %v953_v39   ;;  %561 = vperm.xlu1 %2131, %v475_v41   ;;  %v947_v39 = vmul.f32 0.01, %v2601_v25  ;;  %v1380_v41 = vunpack.c.0.s8 %v2603_v28  ;;  %v2641_v0 = vadd.f32 %v2571_v48, %v481_v36 }
 0x1a7   : > { %v2627_v55 = vcvt.s32.f32 %v1380_v41 }
 0x1a9   : > { %1092 = vperm.xlu0 %2130, %v970_v44   ;;  %646 = vperm.xlu1 %2131, %v508_v45   ;;  %v1349_v44 = vunpack.c.0.s8 %v2610_v34  ;;  %v928_v45 = vmul.f32 0.01, %v896_v30 }
 0x1ad   : > { %1012 = vperm.xlu0 %2130, %v954_v49   ;;  %566 = vperm.xlu1 %2131, %v476_v50   ;;  %v977_v49 = vmax.f32 %v913_v21, %v945_v29  ;;  %v2620_v50 = vrot.slane %v436_v38, %v446_v37  ;;  %v2635_v37 = vcvt.s32.f32 %v1349_v44  ;;  %v1357_v29 = vunpack.c.0.s8 %v2664_v15 }
 0x1ae   : > { %v1359_v44 = vunpack.c.1.s8 %v2664_v15 }
 0x1b1   : > { %1097 = vperm.xlu0 %2130, %v971_v53   ;;  %651 = vperm.xlu1 %2131, %v509_v54   ;;  %v1382_v53 = vunpack.c.1.s8 %v2603_v28  ;;  %v979_v54 = vmax.f32 %v2601_v25, %v947_v39  ;;  %v2675_v25 = vcvt.s32.f32 %v1353_v8  ;;  %v2725_v8 = vld [vmem:[#allocation4 + $0x60] sm:$0xff] }
 0x1b5   : > { %1017 = vperm.xlu0 %2130, %v955_v57   ;;  %571 = vperm.xlu1 %2131, %v477_v58   ;;  %v1350_v57 = vunpack.c.1.s8 %v2608_v33  ;;  %v2631_v58 = vcvt.s32.f32 %v1381_v42  ;;  %v1390_v33 = vunpack.c.1.s8 %v2647_v4 }
 0x1b7   : > { %v2651_v7 = vcvt.s32.f32 %v1350_v57 }
 0x1b9   : > { %1102 = vperm.xlu0 %2130, %v972_v61   ;;  %656 = vperm.xlu1 %2131, %v510_v62   ;;  %v898_v61 = vadd.f32 %v2571_v48, %v480_v18  ;;  %v960_v62 = vmax.f32 %v896_v30, %v928_v45  ;;  %v1386_v48 = vunpack.c.3.s8 %v2603_v28  ;;  %v2681_v30 = vcvt.s32.f32 %v1387_v11 }
 0x1bb   : > { %v930_v16 = vmul.f32 0.01, %v898_v61  ;;  %v2677_v26 = vcvt.s32.f32 %v1386_v48 }
 0x1bd   : > { %1022 = vperm.xlu0 %2130, %v956_v1   ;;  %576 = vperm.xlu1 %2131, %v478_v2   ;;  %v2643_v1 = vcvt.s32.f32 %v1382_v53  ;;  %v1385_v2 = vunpack.c.2.s8 %v2606_v32  ;;  %v2708_v53 = vcvt.s32.f32 %v1390_v33 }
 0x1bf   : > { %v2670_v21 = vcvt.s32.f32 %v1385_v2  ;;  %3877 = vst [vmem:[#allocation12_spill] sm:$0xff] %v2708_v53  ;;  %v2721_v2 = vcvt.s32.f32 %v1359_v44 }
 0x1c1   : > { %1107 = vperm.xlu0 %2130, %v973_v5   ;;  %661 = vperm.xlu1 %2131, %v511_v6   ;;  %v597_v5 = vpop.permute.xlu1 %596  ;;  %v2649_v6 = vcvt.s32.f32 %v1383_v56  ;;  %v1361_v56 = vunpack.c.2.s8 %v2664_v15  ;;  %3880 = vst [vmem:[#allocation15_spill] sm:$0xff] %v2721_v2 }
 0x1c2   : > { %v2694_v41 = vadd.f32 %v2623_v51, %v597_v5 }
 0x1c5   : > { %1027 = vperm.xlu0 %2130, %v957_v9   ;;  %581 = vperm.xlu1 %2131, %v479_v10   ;;  %v2655_v9 = vld [vmem:[#allocation4 + $0x58] sm:$0xff]  ;;  %v2657_v10 = vcvt.s32.f32 %v1351_v59 }
 0x1c7   : > { %v607_v24 = vpop.permute.xlu1 %606 }
 0x1c8   : > { %v2728_v48 = vadd.f32 %v2623_v51, %v607_v24  ;;  %v2731_v11 = vadd.f32 %v2620_v50, %v607_v24 }
 0x1c9   : > { %1112 = vperm.xlu0 %2130, %v974_v13   ;;  %666 = vperm.xlu1 %2131, %v512_v14   ;;  %v1355_v13 = vunpack.c.3.s8 %v2610_v34  ;;  %v2662_v14 = vld [vmem:[#allocation4 + $0x10] sm:$0xff]  ;;  %v962_v34 = vmax.f32 %v898_v61, %v930_v16  ;;  %v1394_v61 = vunpack.c.3.s8 %v2647_v4  ;;  %v2745_v16 = vcvt.s32.f32 %v1361_v56 }
 0x1ca   : > { %v1356_v28 = vunpack.c.0.s8 %v2662_v14  ;;  %v1358_v38 = vunpack.c.1.s8 %v2662_v14  ;;  %v1362_v3 = vunpack.c.3.s8 %v2662_v14  ;;  %v2770_v44 = vmul.f32 0.01, %v2731_v11 }
 0x1cb   : > { %v2685_v32 = vcvt.s32.f32 %v1355_v13  ;;  %v612_v57 = vpop.permute.xlu1 %611  ;;  %3884 = vst [vmem:[#allocation19_spill] sm:$0xff] %v2745_v16  ;;  %v329_v16 = vld [vmem:[%s2555_s30 + $0x18] sm:$0xff] }
 0x1cc   : > { %v2699_v45 = vcvt.s32.f32 %v1356_v28  ;;  %v1396_v28 = vunpack.c.0.s8 %v2725_v8  ;;  %375 = vmatprep.subr.mxu0 %v329_v16  ;;  %v1402_v16 = vunpack.c.3.s8 %v2725_v8 }
 0x1cd   : > { %1032 = vperm.xlu0 %2130, %v958_v17   ;;  %586 = vperm.xlu1 %2131, %v480_v18   ;;  %v961_v17 = vmax.f32 %v897_v46, %v929_v60  ;;  %v2666_v18 = vcvt.s32.f32 %v1384_v63  ;;  %v2701_v46 = vcvt.s32.f32 %v1357_v29  ;;  %v2714_v60 = vcvt.s32.f32 %v1358_v38 }
 0x1ce   : > { %v2719_v63 = vmul.f32 0.01, %v2694_v41 }
 0x1cf   : > { %3876 = vst [vmem:[#allocation11_spill] sm:$0xff] %v2701_v46  ;;  %3879 = vst [vmem:[#allocation14_spill] sm:$0xff] %v2714_v60  ;;  %v327_v60 = vld [vmem:[%s2555_s30 + $0x8] sm:$0xff]  ;;  %v326_v46 = vld [vmem:[%s2555_s30] sm:$0xff] }
 0x1d0   : > { %v845_v33 = vmax.f32 %v2694_v41, %v2719_v63  ;;  %v1398_v63 = vunpack.c.1.s8 %v2725_v8 }
 0x1d1   : > { %1117 = vperm.xlu0 %2130, %v975_v23   ;;  %671 = vperm.xlu1 %2131, %v513_v20   ;;  %v931_v20 = vmul.f32 0.01, %v2641_v0  ;;  %v1389_v23 = vunpack.c.0.s8 %v2655_v9 }
 0x1d3   : > { %v963_v39 = vmax.f32 %v2641_v0, %v931_v20  ;;  %v2696_v43 = vcvt.s32.f32 %v1389_v23  ;;  %v2752_v20 = vadd.f32 %v2620_v50, %v612_v57  ;;  %v2754_v23 = vcvt.s32.f32 %v1394_v61 }
 0x1d5   : > { %1037 = vperm.xlu0 %2130, %v959_v31   ;;  %591 = vperm.xlu1 %2131, %v481_v36   ;;  %v2683_v31 = vcvt.s32.f32 %v1354_v12  ;;  %v1391_v36 = vunpack.c.1.s8 %v2655_v9  ;;  %v2737_v12 = vld [vmem:[#allocation4 + $0x68] sm:$0xff]  ;;  %3885 = vst [vmem:[#allocation20_spill] sm:$0xff] %v2754_v23  ;;  %v2781_v61 = vmul.f32 0.01, %v2752_v20 }
 0x1d6   : > { %v1397_v38 = vunpack.c.0.s8 %v2737_v12  ;;  %v1403_v53 = vunpack.c.3.s8 %v2737_v12 }
 0x1d7   : > { %v2712_v59 = vcvt.s32.f32 %v1391_v36 }
 0x1d9   : > { %1122 = vperm.xlu0 %2130, %v976_v47   ;;  %1127 = vperm.xlu1 %2131, %v977_v49   ;;  %v1392_v47 = vunpack.c.2.s8 %v2647_v4  ;;  %v1393_v49 = vunpack.c.2.s8 %v2655_v9  ;;  %3878 = vst [vmem:[#allocation13_spill] sm:$0xff] %v2712_v59 }
 0x1db   : > { %v2733_v4 = vcvt.s32.f32 %v1392_v47 }
 0x1dd   : > { %1042 = vperm.xlu0 %2130, %v960_v62   ;;  %1132 = vperm.xlu1 %2131, %v978_v52   ;;  %v2706_v52 = vadd.f32 %v2620_v50, %v597_v5  ;;  %v1395_v62 = vunpack.c.3.s8 %v2655_v9  ;;  %v1363_v5 = vunpack.c.3.s8 %v2664_v15  ;;  %3881 = vst [vmem:[#allocation16_spill] sm:$0xff] %v2733_v4  ;;  %v2735_v9 = vcvt.s32.f32 %v1393_v49 }
 0x1de   : > { %v1365_v49 = vunpack.c.0.s8 %v2749_v19  ;;  %v1401_v4 = vunpack.c.2.s8 %v2737_v12 }
 0x1df   : > { %3882 = vst [vmem:[#allocation17_spill] sm:$0xff] %v2735_v9  ;;  %v782_v13 = vmul.f32 0.01, %v2706_v52  ;;  %v2756_v24 = vcvt.s32.f32 %v1395_v62  ;;  %v2763_v36 = vcvt.s32.f32 %v1363_v5  ;;  %v2783_v62 = vcvt.s32.f32 %v1396_v28 }
 0x1e0   : > { %v2810_v28 = vcvt.s32.f32 %v1398_v63 }
 0x1e1   : > { %1047 = vperm.xlu0 %2130, %v961_v17   ;;  %1137 = vperm.xlu1 %2131, %v979_v54   ;;  %v1360_v54 = vunpack.c.2.s8 %v2662_v14  ;;  %v2741_v14 = vadd.f32 %v2623_v51, %v612_v57  ;;  %v2747_v17 = vld [vmem:[#allocation4 + $0x20] sm:$0xff]  ;;  %3886 = vst [vmem:[#allocation21_spill] sm:$0xff] %v2756_v24  ;;  %3888 = vst [vmem:[#allocation23_spill] sm:$0xff] %v2763_v36  ;;  %v846_v57 = vmax.f32 %v2706_v52, %v782_v13 }
 0x1e2   : > { %v1364_v47 = vunpack.c.0.s8 %v2747_v17  ;;  %3889 = vst [vmem:[#allocation24_spill] sm:$0xff] %v2783_v62  ;;  %v2791_v36 = vcvt.s32.f32 %v1397_v38  ;;  %v1400_v52 = vunpack.c.2.s8 %v2725_v8  ;;  %v2802_v24 = vcvt.s32.f32 %v1365_v49  ;;  %3893 = vst [vmem:[#allocation28_spill] sm:$0xff] %v2810_v28  ;;  %v330_v8 = vld [vmem:[%s3809_s1] sm:$0xff] }
 0x1e3   : > { %v2743_v15 = vcvt.s32.f32 %v1360_v54  ;;  %v2775_v54 = vmul.f32 0.01, %v2741_v14  ;;  %v1368_v63 = vunpack.c.2.s8 %v2747_v17 }
 0x1e4   : > { %v517_v42 = vpop.permute.xlu0 %516  ;;  %3890 = vst [vmem:[#allocation25_spill] sm:$0xff] %v2791_v36  ;;  %v2800_v62 = vcvt.s32.f32 %v1364_v47  ;;  %3892 = vst [vmem:[#allocation27_spill] sm:$0xff] %v2802_v24  ;;  %v2821_v2 = vcvt.s32.f32 %v1400_v52 }
 0x1e5   : > { %1052 = vperm.xlu0 %2130, %v962_v34   ;;  %3883 = vst [vmem:[#allocation18_spill] sm:$0xff] %v2743_v15  ;;  %v2761_v34 = vcvt.s32.f32 %v1362_v3  ;;  %v685_v41 = vadd.f32 %v2623_v51, %v517_v42  ;;  %v686_v56 = vadd.f32 %v2620_v50, %v517_v42  ;;  %v1399_v3 = vunpack.c.1.s8 %v2737_v12 }
 0x1e6   : > { %v1367_v42 = vunpack.c.1.s8 %v2749_v19  ;;  %3891 = vst [vmem:[#allocation26_spill] sm:$0xff] %v2800_v62  ;;  %3897 = vst [vmem:[#allocation32_spill] sm:$0xff] %v2821_v2 }
 0x1e7   : > { %3887 = vst [vmem:[#allocation22_spill] sm:$0xff] %v2761_v34  ;;  %v1366_v34 = vunpack.c.1.s8 %v2747_v17  ;;  %v749_v38 = vmul.f32 0.01, %v685_v41  ;;  %v750_v36 = vmul.f32 0.01, %v686_v56  ;;  %v2812_v47 = vcvt.s32.f32 %v1399_v3 }
 0x1e8   : > { %v602_v0 = vpop.permute.xlu0 %601  ;;  %v2818_v9 = vcvt.s32.f32 %v1367_v42  ;;  %v1369_v3 = vunpack.c.2.s8 %v2749_v19 }
 0x1e9   : > { %1057 = vperm.xlu0 %2130, %v963_v39   ;;  %v2767_v39 = vmul.f32 0.01, %v2728_v48  ;;  %v719_v23 = vadd.f32 %v2623_v51, %v602_v0  ;;  %v720_v15 = vadd.f32 %v2620_v50, %v602_v0  ;;  %3894 = vst [vmem:[#allocation29_spill] sm:$0xff] %v2812_v47  ;;  %v2816_v62 = vcvt.s32.f32 %v1366_v34  ;;  %v328_v0 = vld [vmem:[%s2555_s30 + $0x10] sm:$0xff]  ;;  %s3759_s30 = scalar_lea.hbm %s3812_s4, %s1992_s22 }
 0x1ea   : > { %3896 = vst [vmem:[#allocation31_spill] sm:$0xff] %v2818_v9  ;;  %v813_v42 = vmax.f32 %v685_v41, %v749_v38  ;;  %v814_v9 = vmax.f32 %v686_v56, %v750_v36  ;;  %376 = vmatpush1.msra.mxu0 %v328_v0  ;;  %v2837_v56 = vcvt.s32.f32 %v1368_v63 }
 0x1eb   : > { %3895 = vst [vmem:[#allocation30_spill] sm:$0xff] %v2816_v62  ;;  %v783_v47 = vmul.f32 0.01, %v719_v23  ;;  %v784_v62 = vmul.f32 0.01, %v720_v15  ;;  %377 = vmatprep.subr.mxu0 %v327_v60 }
 0x1ec   : > { %v522_v29 = vpop.permute.xlu0 %521  ;;  %378 = vmatpush1.msra.mxu0 %v326_v46  ;;  %v2847_v46 = vcvt.s32.f32 %v1402_v16 }
 0x1ed   : > { %v687_v34 = vadd.f32 %v2623_v51, %v522_v29  ;;  %v688_v52 = vadd.f32 %v2620_v50, %v522_v29  ;;  %v3815_v29 = vmov 0.0   ;;  %v847_v60 = vmax.f32 %v719_v23, %v783_v47 }
 0x1ee   : > { %411 = vmatprep.mubr.f32.mxu0 %v3815_v29  ;;  %v1370_v23 = vunpack.c.3.s8 %v2747_v17 }
 0x1ef   : > { %v752_v12 = vmul.f32 0.01, %v688_v52  ;;  %1981 = vmatmul.mubr.msk.f32.vlgmr.msra.gmra.mxu0 %vm334_vm2, %v330_v8 }
 0x1f0   : > { %v2787_v5 = vpop.permute.xlu0 %526  ;;  %v2789_v40 = vpop.permute.xlu1 %531  ;;  %417 = vmatprep.mubr.f32.mxu0 %v3815_v29 }
 0x1f4   : > { %v1063_v49 = vpop.permute.xlu0 %1062  ;;  %v2814_v24 = vpop.permute.xlu1 %616 }
 0x1f5   : > { %v1172_v59 = vsub.f32 %v845_v33, %v1063_v49  ;;  %v1173_v13 = vsub.f32 %v846_v57, %v1063_v49  ;;  %v2832_v49 = vcvt.s32.f32 %v1401_v4  ;;  %v1346_v4 = vld [vmem:[#allocation4 + $0x70] sm:$0xff] }
 0x1f7   : > { %v1268_v2 = vmul.f32 1.442695, %v1172_v59  ;;  %v1270_v28 = vmul.f32 1.442695, %v1173_v13  ;;  %v751_v59 = vmul.f32 0.01, %v687_v34  ;;  %v2840_v13 = vcvt.s32.f32 %v1369_v3 }
 0x1f8   : > { %v983_v33 = vpop.permute.xlu0 %982  ;;  %v2830_v57 = vpop.permute.xlu1 %536  ;;  %v1371_v3 = vunpack.c.3.s8 %v2749_v19  ;;  %v2863_v19 = vadd.f32 %v2623_v51, %v2789_v40 }
 0x1f9   : > { %2132 = vpow2.f32 %v1268_v2  ;;  %v1140_v41 = vsub.f32 %v813_v42, %v983_v33  ;;  %v1141_v36 = vsub.f32 %v814_v9, %v983_v33  ;;  %v848_v9 = vmax.f32 %v720_v15, %v784_v62  ;;  %v2853_v33 = vld [vmem:[#allocation4 + $0x78] sm:$0xff] }
 0x1fa   : > { %2134 = vpow2.f32 %v1270_v28  ;;  %v2849_v42 = vcvt.s32.f32 %v1403_v53  ;;  %v689_v15 = vadd.f32 %v2623_v51, %v2787_v5  ;;  %v690_v62 = vadd.f32 %v2620_v50, %v2787_v5 }
 0x1fb   : > { %v1204_v2 = vmul.f32 1.442695, %v1140_v41  ;;  %v1206_v38 = vmul.f32 1.442695, %v1141_v36  ;;  %v1404_v53 = vunpack.c.0.s8 %v1346_v4  ;;  %v815_v41 = vmax.f32 %v687_v34, %v751_v59 }
 0x1fc   : > { %v1068_v0 = vpop.permute.xlu0 %1067  ;;  %v2845_v63 = vpop.permute.xlu1 %621  ;;  %v816_v36 = vmax.f32 %v688_v52, %v752_v12  ;;  %v1406_v5 = vunpack.c.1.s8 %v1346_v4  ;;  %v2870_v29 = vcvt.s32.f32 %v1371_v3  ;;  %v754_v34 = vmul.f32 0.01, %v690_v62 }
 0x1fd   : > { %2136 = vpow2.f32 %v1204_v2  ;;  %v1174_v28 = vsub.f32 %v847_v60, %v1068_v0  ;;  %v1175_v47 = vsub.f32 %v848_v9, %v1068_v0  ;;  %v2867_v2 = vcvt.s32.f32 %v1370_v23 }
 0x1fe   : > { %2138 = vpow2.f32 %v1206_v38  ;;  %v1405_v9 = vunpack.c.0.s8 %v2853_v33  ;;  %v2874_v52 = vadd.f32 %v2620_v50, %v2789_v40  ;;  %v2880_v4 = vmul.f32 0.01, %v2863_v19 }
 0x1ff   : > { %v1272_v17 = vmul.f32 1.442695, %v1174_v28  ;;  %v1274_v16 = vmul.f32 1.442695, %v1175_v47  ;;  %v753_v28 = vmul.f32 0.01, %v689_v15  ;;  %v2876_v47 = vcvt.s32.f32 %v1404_v53 }
 0x200   : > { %v988_v60 = vpop.permute.xlu0 %987  ;;  %v2865_v8 = vpop.permute.xlu1 %541  ;;  %v2884_v3 = vadd.f32 %v2623_v51, %v2814_v24  ;;  %v2890_v40 = vcvt.s32.f32 %v1406_v5  ;;  %v2894_v53 = vadd.f32 %v2620_v50, %v2814_v24  ;;  %v818_v5 = vmax.f32 %v690_v62, %v754_v34 }
 0x201   : > { %2140 = vpow2.f32 %v1272_v17  ;;  %v1142_v38 = vsub.f32 %v815_v41, %v988_v60  ;;  %v1143_v0 = vsub.f32 %v816_v36, %v988_v60  ;;  %3898 = vst [vmem:[#allocation33_spill] sm:$0xff] %v2876_v47  ;;  %v2888_v36 = vcvt.s32.f32 %v1405_v9 }
 0x202   : > { %2142 = vpow2.f32 %v1274_v16  ;;  %3900 = vst [vmem:[#allocation35_spill] sm:$0xff] %v2890_v40  ;;  %v3901_v16 = vmax.f32 %v2728_v48, %v2767_v39  ;;  %v2903_v47 = vmul.f32 0.01, %v2874_v52  ;;  %v817_v9 = vmax.f32 %v689_v15, %v753_v28 }
 0x203   : > { %v1208_v59 = vmul.f32 1.442695, %v1142_v38  ;;  %v1210_v12 = vmul.f32 1.442695, %v1143_v0  ;;  %3899 = vst [vmem:[#allocation34_spill] sm:$0xff] %v2888_v36  ;;  %v3902_v38 = vmax.f32 %v2731_v11, %v2770_v44  ;;  %v2907_v24 = vadd.f32 %v2623_v51, %v2830_v57 }
 0x204   : > { %v1073_v17 = vpop.permute.xlu0 %1072  ;;  %v2886_v41 = vpop.permute.xlu1 %626  ;;  %v2913_v11 = vmul.f32 0.01, %v2884_v3  ;;  %v2917_v39 = vadd.f32 %v2620_v50, %v2830_v57  ;;  %v819_v28 = vmax.f32 %v2863_v19, %v2880_v4  ;;  %v2927_v34 = vmul.f32 0.01, %v2894_v53 }
 0x205   : > { %2144 = vpow2.f32 %v1208_v59  ;;  %v1176_v60 = vsub.f32 %v3901_v16, %v1073_v17  ;;  %v1177_v0 = vsub.f32 %v3902_v38, %v1073_v17  ;;  %v2931_v57 = vadd.f32 %v2623_v51, %v2845_v63 }
 0x206   : > { %v2133_v23 = vpop.eup %2132  ;;  %2146 = vpow2.f32 %v1210_v12  ;;  %v2938_v19 = vmul.f32 0.01, %v2907_v24  ;;  %v2944_v38 = vmul.f32 0.01, %v2917_v39 }
 0x207   : > { %v2135_v40 = vpop.eup %2134  ;;  %v1276_v59 = vmul.f32 1.442695, %v1176_v60  ;;  %v1278_v36 = vmul.f32 1.442695, %v1177_v0  ;;  %v2910_v48 = vmul.f32 %v2133_v23, %v2627_v55 }
 0x208   : > { %v993_v44 = vpop.permute.xlu0 %992  ;;  %v2919_v15 = vpop.permute.xlu1 %546  ;;  %v2922_v62 = vmul.f32 %v2135_v40, %v2631_v58  ;;  %v820_v58 = vmax.f32 %v2874_v52, %v2903_v47  ;;  %v853_v47 = vmax.f32 %v2884_v3, %v2913_v11  ;;  %v2970_v3 = vmul.f32 0.01, %v2931_v57 }
 0x209   : > { %3903 = vst [vmem:[#allocation36_spill] sm:$0xff] %v2910_v48  ;;  %2148 = vpow2.f32 %v1276_v59  ;;  %v1144_v55 = vsub.f32 %v817_v9, %v993_v44  ;;  %v1145_v12 = vsub.f32 %v818_v5, %v993_v44  ;;  %v3907_v5 = vmax.f32 %v2741_v14, %v2775_v54 }
 0x20a   : > { %3904 = vst [vmem:[#allocation37_spill] sm:$0xff] %v2922_v62  ;;  %v2137_v23 = vpop.eup %2136  ;;  %2150 = vpow2.f32 %v1278_v36  ;;  %v1588_v17 = vadd.f32 %v2922_v62, %v2910_v48  ;;  %v2948_v36 = vadd.f32 %v2620_v50, %v2845_v63  ;;  %v3908_v59 = vmax.f32 %v2752_v20, %v2781_v61 }
 0x20b   : > { %v2139_v40 = vpop.eup %2138  ;;  %v1212_v4 = vmul.f32 1.442695, %v1144_v55  ;;  %v1214_v16 = vmul.f32 1.442695, %v1145_v12  ;;  %v2941_v60 = vmul.f32 %v2137_v23, %v2633_v27  ;;  %v331_v27 = vld [vmem:[%s3809_s1 + $0x8] sm:$0xff]  ;;  %v2974_v11 = vadd.f32 %v2623_v51, %v2865_v8 }
 0x20c   : > { %1589 = vadd.xlane.f32.xlu1 %v1588_v17  ;;  %v1078_v0 = vpop.permute.xlu0 %1077  ;;  %v2950_v9 = vpop.permute.xlu1 %631  ;;  %v2953_v52 = vmul.f32 %v2139_v40, %v2635_v37  ;;  %v854_v37 = vmax.f32 %v2894_v53, %v2927_v34  ;;  %1982 = vmatmul.mubr.msk.f32.gmra.mxu0 %vm334_vm2, %v331_v27  ;;  %v3909_v54 = vmov 0.0   ;;  %v821_v34 = vmax.f32 %v2907_v24, %v2938_v19  ;;  %v332_v24 = vld [vmem:[%s3809_s1 + $0x10] sm:$0xff] }
 0x20d   : > { %3905 = vst [vmem:[#allocation38_spill] sm:$0xff] %v2941_v60  ;;  %2152 = vpow2.f32 %v1212_v4  ;;  %v1178_v63 = vsub.f32 %v3907_v5, %v1078_v0  ;;  %v1179_v44 = vsub.f32 %v3908_v59, %v1078_v0  ;;  %423 = vmatprep.mubr.f32.mxu0 %v3909_v54  ;;  %v2985_v23 = vmul.f32 0.01, %v2948_v36 }
 0x20e   : > { %3906 = vst [vmem:[#allocation39_spill] sm:$0xff] %v2953_v52  ;;  %v2141_v55 = vpop.eup %2140  ;;  %2154 = vpow2.f32 %v1214_v16  ;;  %v1540_v14 = vadd.f32 %v2953_v52, %v2941_v60  ;;  %v2989_v17 = vadd.f32 %v2620_v50, %v2865_v8  ;;  %v3003_v19 = vadd.f32 %v2623_v51, %v2886_v41  ;;  %v3947_v60 = vld [vmem:[#allocation21_spill] sm:$0xff] }
 0x20f   : > { %v2143_v20 = vpop.eup %2142  ;;  %v1280_v61 = vmul.f32 1.442695, %v1178_v63  ;;  %v1282_v12 = vmul.f32 1.442695, %v1179_v44  ;;  %v2980_v53 = vmul.f32 %v2141_v55, %v2643_v1  ;;  %v822_v1 = vmax.f32 %v2917_v39, %v2944_v38 }
 0x210   : > { %1541 = vadd.xlane.f32.xlu0 %v1540_v14  ;;  %v998_v40 = vpop.permute.xlu0 %997  ;;  %v2991_v4 = vpop.permute.xlu1 %551  ;;  %v2994_v16 = vmul.f32 %v2143_v20, %v2649_v6  ;;  %1983 = vmatmul.mubr.msk.f32.gmra.mxu0 %vm334_vm2, %v332_v24  ;;  %v3007_v6 = vmul.f32 0.01, %v2974_v11  ;;  %v855_v38 = vmax.f32 %v2931_v57, %v2970_v3  ;;  %v3022_v44 = vmul.f32 0.01, %v2989_v17 }
 0x211   : > { %3910 = vst [vmem:[#allocation40_spill] sm:$0xff] %v2980_v53  ;;  %2156 = vpow2.f32 %v1280_v61  ;;  %v1146_v8 = vsub.f32 %v819_v28, %v998_v40  ;;  %v1147_v0 = vsub.f32 %v820_v58, %v998_v40  ;;  %429 = vmatprep.mubr.f32.mxu0 %v3909_v54  ;;  %v3016_v28 = vadd.f32 %v2620_v50, %v2886_v41 }
 0x212   : > { %3911 = vst [vmem:[#allocation41_spill] sm:$0xff] %v2994_v16  ;;  %v2145_v27 = vpop.eup %2144  ;;  %2158 = vpow2.f32 %v1282_v12  ;;  %v1591_v39 = vadd.f32 %v2994_v16, %v2980_v53  ;;  %v3026_v55 = vadd.f32 %v2623_v51, %v2919_v15  ;;  %v856_v41 = vmax.f32 %v2948_v36, %v2985_v23 }
 0x213   : > { %v2147_v5 = vpop.eup %2146  ;;  %v1216_v58 = vmul.f32 1.442695, %v1146_v8  ;;  %v1218_v63 = vmul.f32 1.442695, %v1147_v0  ;;  %v3019_v59 = vmul.f32 %v2145_v27, %v2651_v7  ;;  %v333_v7 = vld [vmem:[%s3809_s1 + $0x18] sm:$0xff]  ;;  %v823_v23 = vmax.f32 %v2974_v11, %v3007_v6 }
 0x214   : > { %1592 = vadd.xlane.f32.xlu0 %v1591_v39  ;;  %v1083_v57 = vpop.permute.xlu0 %1082  ;;  %v637_v3 = vpop.permute.xlu1 %636  ;;  %v3029_v14 = vmul.f32 %v2147_v5, %v2657_v10  ;;  %v3037_v54 = vmul.f32 0.01, %v3003_v19  ;;  %1984 = vmatmul.mubr.msk.f32.gmra.mxu0 %vm334_vm2, %v333_v7  ;;  %v3042_v10 = vadd.f32 %v2620_v50, %v2919_v15  ;;  %v3049_v24 = vmul.f32 0.01, %v3016_v28 }
 0x215   : > { %3912 = vst [vmem:[#allocation42_spill] sm:$0xff] %v3019_v59  ;;  %2160 = vpow2.f32 %v1216_v58  ;;  %v1180_v20 = vsub.f32 %v853_v47, %v1083_v57  ;;  %v1181_v61 = vsub.f32 %v854_v37, %v1083_v57  ;;  %v3055_v0 = vmul.f32 0.01, %v3026_v55 }
 0x216   : > { %3913 = vst [vmem:[#allocation43_spill] sm:$0xff] %v3029_v14  ;;  %v2149_v12 = vpop.eup %2148  ;;  %2162 = vpow2.f32 %v1218_v63  ;;  %v1543_v36 = vadd.f32 %v3029_v14, %v3019_v59  ;;  %v3059_v15 = vadd.f32 %v2623_v51, %v2950_v9  ;;  %v824_v6 = vmax.f32 %v2989_v17, %v3022_v44 }
 0x217   : > { %v2151_v40 = vpop.eup %2150  ;;  %v1284_v47 = vmul.f32 1.442695, %v1180_v20  ;;  %v1286_v37 = vmul.f32 1.442695, %v1181_v61  ;;  %v3052_v8 = vmul.f32 %v2149_v12, %v2666_v18  ;;  %v857_v58 = vmax.f32 %v3003_v19, %v3037_v54 }
 0x218   : > { %1544 = vadd.xlane.f32.xlu1 %v1543_v36  ;;  %v1003_v27 = vpop.permute.xlu0 %1002  ;;  %v557_v39 = vpop.permute.xlu1 %556  ;;  %v3062_v11 = vmul.f32 %v2151_v40, %v2670_v21  ;;  %v3069_v57 = vmul.f32 0.01, %v3042_v10  ;;  %v3073_v7 = vadd.f32 %v2620_v50, %v2950_v9  ;;  %v3083_v19 = vmul.f32 0.01, %v3059_v15 }
 0x219   : > { %3914 = vst [vmem:[#allocation44_spill] sm:$0xff] %v3052_v8  ;;  %2164 = vpow2.f32 %v1284_v47  ;;  %v1148_v5 = vsub.f32 %v821_v34, %v1003_v27  ;;  %v1149_v18 = vsub.f32 %v822_v1, %v1003_v27  ;;  %v858_v1 = vmax.f32 %v3016_v28, %v3049_v24 }
 0x21a   : > { %3915 = vst [vmem:[#allocation45_spill] sm:$0xff] %v3062_v11  ;;  %v2153_v63 = vpop.eup %2152  ;;  %2166 = vpow2.f32 %v1286_v37  ;;  %v1594_v21 = vadd.f32 %v3062_v11, %v3052_v8  ;;  %v3087_v9 = vadd.f32 %v2623_v51, %v2991_v4  ;;  %v3096_v36 = vadd.f32 %v2620_v50, %v2991_v4 }
 0x21b   : > { %v2155_v20 = vpop.eup %2154  ;;  %v1220_v17 = vmul.f32 1.442695, %v1148_v5  ;;  %v1222_v44 = vmul.f32 1.442695, %v1149_v18  ;;  %v3078_v34 = vmul.f32 %v2153_v63, %v2672_v22  ;;  %v825_v22 = vmax.f32 %v3026_v55, %v3055_v0 }
 0x21c   : > { %1595 = vadd.xlane.f32.xlu0 %v1594_v21  ;;  %v1088_v54 = vpop.permute.xlu0 %1087  ;;  %v642_v61 = vpop.permute.xlu1 %641  ;;  %v3090_v12 = vmul.f32 %v2155_v20, %v2675_v25  ;;  %v3099_v47 = vmul.f32 0.01, %v3073_v7  ;;  %v826_v25 = vmax.f32 %v3042_v10, %v3069_v57  ;;  %v3106_v5 = vadd.f32 %v2623_v51, %v637_v3 }
 0x21d   : > { %3916 = vst [vmem:[#allocation46_spill] sm:$0xff] %v3078_v34  ;;  %2168 = vpow2.f32 %v1220_v17  ;;  %v1182_v28 = vsub.f32 %v855_v38, %v1088_v54  ;;  %v1183_v40 = vsub.f32 %v856_v41, %v1088_v54  ;;  %v3112_v41 = vmul.f32 0.01, %v3087_v9 }
 0x21e   : > { %3917 = vst [vmem:[#allocation47_spill] sm:$0xff] %v3090_v12  ;;  %v2157_v24 = vpop.eup %2156  ;;  %2170 = vpow2.f32 %v1222_v44  ;;  %v1546_v37 = vadd.f32 %v3090_v12, %v3078_v34  ;;  %v3115_v63 = vadd.f32 %v2620_v50, %v637_v3  ;;  %v3123_v17 = vmul.f32 0.01, %v3096_v36 }
 0x21f   : > { %v2159_v27 = vpop.eup %2158  ;;  %v1288_v4 = vmul.f32 1.442695, %v1182_v28  ;;  %v1290_v18 = vmul.f32 1.442695, %v1183_v40  ;;  %v3109_v38 = vmul.f32 %v2157_v24, %v2677_v26  ;;  %v3126_v28 = vadd.f32 %v2623_v51, %v557_v39 }
 0x220   : > { %1547 = vadd.xlane.f32.xlu1 %v1546_v37  ;;  %v1008_v21 = vpop.permute.xlu0 %1007  ;;  %v562_v20 = vpop.permute.xlu1 %561  ;;  %v3118_v10 = vmul.f32 %v2159_v27, %v2681_v30  ;;  %v860_v30 = vmax.f32 %v3073_v7, %v3099_v47  ;;  %v3133_v24 = vmul.f32 0.01, %v3106_v5 }
 0x221   : > { %3918 = vst [vmem:[#allocation48_spill] sm:$0xff] %v3109_v38  ;;  %2172 = vpow2.f32 %v1288_v4  ;;  %v1150_v26 = vsub.f32 %v823_v23, %v1008_v21  ;;  %v1151_v44 = vsub.f32 %v824_v6, %v1008_v21  ;;  %v3139_v6 = vmul.f32 0.01, %v3115_v63 }
 0x222   : > { %3919 = vst [vmem:[#allocation49_spill] sm:$0xff] %v3118_v10  ;;  %v2161_v54 = vpop.eup %2160  ;;  %2174 = vpow2.f32 %v1290_v18  ;;  %v1597_v3 = vadd.f32 %v3118_v10, %v3109_v38  ;;  %v3142_v4 = vadd.f32 %v2620_v50, %v557_v39  ;;  %v3152_v57 = vmul.f32 0.01, %v3126_v28 }
 0x223   : > { %v2163_v40 = vpop.eup %2162  ;;  %v1224_v37 = vmul.f32 1.442695, %v1150_v26  ;;  %v1226_v27 = vmul.f32 1.442695, %v1151_v44  ;;  %v3136_v23 = vmul.f32 %v2161_v54, %v2683_v31  ;;  %v828_v31 = vmax.f32 %v3096_v36, %v3123_v17 }
 0x224   : > { %1598 = vadd.xlane.f32.xlu0 %v1597_v3  ;;  %v1093_v18 = vpop.permute.xlu0 %1092  ;;  %v647_v21 = vpop.permute.xlu1 %646  ;;  %v3145_v7 = vmul.f32 %v2163_v40, %v2685_v32  ;;  %v3155_v39 = vadd.f32 %v2623_v51, %v642_v61  ;;  %v3165_v36 = vmul.f32 0.01, %v3142_v4  ;;  %v3168_v17 = vadd.f32 %v2620_v50, %v642_v61 }
 0x225   : > { %3920 = vst [vmem:[#allocation50_spill] sm:$0xff] %v3136_v23  ;;  %2176 = vpow2.f32 %v1224_v37  ;;  %v1184_v26 = vsub.f32 %v857_v58, %v1093_v18  ;;  %v1185_v44 = vsub.f32 %v858_v1, %v1093_v18  ;;  %v3189_v1 = vadd.f32 %v2620_v50, %v562_v20 }
 0x226   : > { %3921 = vst [vmem:[#allocation51_spill] sm:$0xff] %v3145_v7  ;;  %v2165_v54 = vpop.eup %2164  ;;  %2178 = vpow2.f32 %v1226_v27  ;;  %v1549_v32 = vadd.f32 %v3145_v7, %v3136_v23  ;;  %v3195_v0 = vmul.f32 0.01, %v3168_v17 }
 0x227   : > { %v2167_v3 = vpop.eup %2166  ;;  %v1292_v40 = vmul.f32 1.442695, %v1184_v26  ;;  %v1294_v47 = vmul.f32 1.442695, %v1185_v44  ;;  %v3160_v58 = vmul.f32 %v2165_v54, %v2688_v35  ;;  %v3176_v35 = vadd.f32 %v2623_v51, %v562_v20 }
 0x228   : > { %1550 = vadd.xlane.f32.xlu1 %v1549_v32  ;;  %v1013_v37 = vpop.permute.xlu0 %1012  ;;  %v567_v27 = vpop.permute.xlu1 %566  ;;  %v3171_v18 = vmul.f32 %v2167_v3, %v2696_v43  ;;  %v3182_v32 = vmul.f32 0.01, %v3155_v39  ;;  %v3219_v53 = vmul.f32 0.01, %v3189_v1 }
 0x229   : > { %3922 = vst [vmem:[#allocation52_spill] sm:$0xff] %v3160_v58  ;;  %2180 = vpow2.f32 %v1292_v40  ;;  %v1152_v44 = vsub.f32 %v825_v22, %v1013_v37  ;;  %v1153_v54 = vsub.f32 %v826_v25, %v1013_v37  ;;  %v3198_v22 = vadd.f32 %v2623_v51, %v647_v21  ;;  %v3924_v37 = vld [vmem:[#allocation11_spill] sm:$0xff] }
 0x22a   : > { %3923 = vst [vmem:[#allocation53_spill] sm:$0xff] %v3171_v18  ;;  %v2169_v61 = vpop.eup %2168  ;;  %2182 = vpow2.f32 %v1294_v47  ;;  %v1600_v43 = vadd.f32 %v3171_v18, %v3160_v58  ;;  %v3244_v38 = vadd.f32 %v2620_v50, %v567_v27 }
 0x22b   : > { %v2171_v26 = vpop.eup %2170  ;;  %v1228_v40 = vmul.f32 1.442695, %v1152_v44  ;;  %v1230_v48 = vmul.f32 1.442695, %v1153_v54  ;;  %v3192_v55 = vmul.f32 %v2169_v61, %v2699_v45  ;;  %v3206_v44 = vmul.f32 0.01, %v3176_v35 }
 0x22c   : > { %1601 = vadd.xlane.f32.xlu0 %v1600_v43  ;;  %v1098_v25 = vpop.permute.xlu0 %1097  ;;  %v652_v47 = vpop.permute.xlu1 %651  ;;  %v3201_v3 = vmul.f32 %v2171_v26, %v3924_v37  ;;  %v3925_v45 = vmax.f32 %v3059_v15, %v3083_v19  ;;  %v3212_v43 = vadd.f32 %v2620_v50, %v647_v21  ;;  %v3926_v15 = vld [vmem:[#allocation12_spill] sm:$0xff]  ;;  %v3274_v18 = vmul.f32 0.01, %v3244_v38 }
 0x22d   : > { %2184 = vpow2.f32 %v1228_v40  ;;  %v1187_v61 = vsub.f32 %v860_v30, %v1098_v25  ;;  %v3225_v30 = vmul.f32 0.01, %v3198_v22 }
 0x22e   : > { %v1186_v54 = vsub.f32 %v3925_v45, %v1098_v25  ;;  %v2173_v62 = vpop.eup %2172  ;;  %2186 = vpow2.f32 %v1230_v48  ;;  %v1552_v26 = vadd.f32 %v3201_v3, %v3192_v55  ;;  %v3228_v48 = vadd.f32 %v2623_v51, %v567_v27  ;;  %v3928_v45 = vld [vmem:[#allocation13_spill] sm:$0xff] }
 0x22f   : > { %v2175_v20 = vpop.eup %2174  ;;  %v1298_v16 = vmul.f32 1.442695, %v1187_v61  ;;  %v3222_v19 = vmul.f32 %v2173_v62, %v3926_v15  ;;  %v3930_v62 = vmax.f32 %v3087_v9, %v3112_v41  ;;  %v3931_v9 = vld [vmem:[#allocation14_spill] sm:$0xff]  ;;  %v3932_v15 = vld [vmem:[#allocation15_spill] sm:$0xff] }
 0x230   : > { %v1296_v40 = vmul.f32 1.442695, %v1186_v54  ;;  %1553 = vadd.xlane.f32.xlu1 %v1552_v26  ;;  %v1018_v21 = vpop.permute.xlu0 %1017  ;;  %v572_v25 = vpop.permute.xlu1 %571  ;;  %v3231_v37 = vmul.f32 %v2175_v20, %v3928_v45  ;;  %v3241_v26 = vmul.f32 0.01, %v3212_v43 }
 0x231   : > { %3927 = vst [vmem:[#allocation11_spill] sm:$0xff] %v3222_v19  ;;  %v1154_v54 = vsub.f32 %v3930_v62, %v1018_v21  ;;  %v1155_v61 = vsub.f32 %v828_v31, %v1018_v21  ;;  %v3254_v21 = vmul.f32 0.01, %v3228_v48  ;;  %v3257_v62 = vadd.f32 %v2623_v51, %v652_v47 }
 0x232   : > { %3929 = vst [vmem:[#allocation12_spill] sm:$0xff] %v3231_v37  ;;  %2188 = vpow2.f32 %v1296_v40  ;;  %v2177_v11 = vpop.eup %2176  ;;  %v1603_v20 = vadd.f32 %v3231_v37, %v3222_v19  ;;  %v3934_v31 = vmax.f32 %v3115_v63, %v3139_v6 }
 0x233   : > { %2190 = vpow2.f32 %v1298_v16  ;;  %v2179_v40 = vpop.eup %2178  ;;  %v1232_v45 = vmul.f32 1.442695, %v1154_v54  ;;  %v1234_v8 = vmul.f32 1.442695, %v1155_v61  ;;  %v3249_v41 = vmul.f32 %v2177_v11, %v3931_v9 }
 0x234   : > { %1604 = vadd.xlane.f32.xlu0 %v1603_v20  ;;  %v1103_v16 = vpop.permute.xlu0 %1102  ;;  %v657_v27 = vpop.permute.xlu1 %656  ;;  %v3260_v10 = vmul.f32 %v2179_v40, %v3932_v15  ;;  %v3265_v11 = vadd.f32 %v2620_v50, %v652_v47  ;;  %v3933_v61 = vmax.f32 %v3106_v5, %v3133_v24  ;;  %v3277_v15 = vadd.f32 %v2623_v51, %v572_v25  ;;  %v3935_v5 = vld [vmem:[#allocation16_spill] sm:$0xff] }
 0x235   : > { %2192 = vpow2.f32 %v1232_v45  ;;  %v1189_v20 = vsub.f32 %v3934_v31, %v1103_v16  ;;  %v3287_v6 = vmul.f32 0.01, %v3257_v62 }
 0x236   : > { %v1188_v9 = vsub.f32 %v3933_v61, %v1103_v16  ;;  %v2181_v58 = vpop.eup %2180  ;;  %2194 = vpow2.f32 %v1234_v8  ;;  %v1555_v47 = vadd.f32 %v3260_v10, %v3249_v41  ;;  %v3290_v8 = vadd.f32 %v2620_v50, %v572_v25  ;;  %v3937_v61 = vld [vmem:[#allocation17_spill] sm:$0xff] }
 0x237   : > { %v2183_v40 = vpop.eup %2182  ;;  %v1302_v54 = vmul.f32 1.442695, %v1189_v20  ;;  %v3282_v24 = vmul.f32 %v2181_v58, %v3935_v5  ;;  %v3298_v58 = vmul.f32 0.01, %v3265_v11  ;;  %v3939_v20 = vmax.f32 %v3126_v28, %v3152_v57 }
 0x238   : > { %v1300_v45 = vmul.f32 1.442695, %v1188_v9  ;;  %1556 = vadd.xlane.f32.xlu1 %v1555_v47  ;;  %v1023_v31 = vpop.permute.xlu0 %1022  ;;  %v577_v16 = vpop.permute.xlu1 %576  ;;  %v3293_v19 = vmul.f32 %v2183_v40, %v3937_v61  ;;  %v3940_v25 = vmax.f32 %v3142_v4, %v3165_v36  ;;  %v3307_v37 = vmul.f32 0.01, %v3277_v15 }
 0x239   : > { %3936 = vst [vmem:[#allocation13_spill] sm:$0xff] %v3282_v24  ;;  %v1156_v5 = vsub.f32 %v3939_v20, %v1023_v31  ;;  %v3314_v9 = vadd.f32 %v2623_v51, %v657_v27  ;;  %v3941_v20 = vld [vmem:[#allocation18_spill] sm:$0xff]  ;;  %v3320_v36 = vmul.f32 0.01, %v3290_v8 }
 0x23a   : > { %3938 = vst [vmem:[#allocation14_spill] sm:$0xff] %v3293_v19  ;;  %2196 = vpow2.f32 %v1300_v45  ;;  %v1157_v47 = vsub.f32 %v3940_v25, %v1023_v31  ;;  %v2185_v63 = vpop.eup %2184  ;;  %v1606_v40 = vadd.f32 %v3293_v19, %v3282_v24  ;;  %v3942_v24 = vld [vmem:[#allocation19_spill] sm:$0xff] }
 0x23b   : > { %2198 = vpow2.f32 %v1302_v54  ;;  %v2187_v45 = vpop.eup %2186  ;;  %v1236_v57 = vmul.f32 1.442695, %v1156_v5  ;;  %v3317_v4 = vmul.f32 %v2185_v63, %v3941_v20  ;;  %v3323_v54 = vadd.f32 %v2620_v50, %v657_v27 }
 0x23c   : > { %v1238_v28 = vmul.f32 1.442695, %v1157_v47  ;;  %1607 = vadd.xlane.f32.xlu0 %v1606_v40  ;;  %v1108_v31 = vpop.permute.xlu0 %1107  ;;  %v662_v25 = vpop.permute.xlu1 %661  ;;  %v3326_v61 = vmul.f32 %v2187_v45, %v3942_v24  ;;  %v3943_v63 = vmax.f32 %v3155_v39, %v3182_v32  ;;  %v3944_v47 = vmax.f32 %v3168_v17, %v3195_v0 }
 0x23d   : > { %2200 = vpow2.f32 %v1236_v57  ;;  %v3339_v24 = vadd.f32 %v2623_v51, %v577_v16  ;;  %v3346_v32 = vmul.f32 0.01, %v3314_v9  ;;  %v3358_v27 = vadd.f32 %v2623_v51, %v662_v25 }
 0x23e   : > { %v1190_v5 = vsub.f32 %v3943_v63, %v1108_v31  ;;  %v1191_v20 = vsub.f32 %v3944_v47, %v1108_v31  ;;  %2202 = vpow2.f32 %v1238_v28  ;;  %v1558_v45 = vadd.f32 %v3326_v61, %v3317_v4  ;;  %v3945_v31 = vld [vmem:[#allocation20_spill] sm:$0xff] }
 0x23f   : > { %v2189_v40 = vpop.eup %2188  ;;  %v3352_v28 = vmul.f32 0.01, %v3323_v54  ;;  %v3355_v47 = vadd.f32 %v2620_v50, %v577_v16 }
 0x240   : > { %v2191_v39 = vpop.eup %2190  ;;  %v1304_v17 = vmul.f32 1.442695, %v1190_v5  ;;  %v1306_v0 = vmul.f32 1.442695, %v1191_v20  ;;  %v3349_v63 = vmul.f32 %v2189_v40, %v3945_v31  ;;  %1559 = vadd.xlane.f32.xlu1 %v1558_v45  ;;  %v1028_v57 = vpop.permute.xlu0 %1027  ;;  %v3949_v5 = vmax.f32 %v3176_v35, %v3206_v44 }
 0x241   : > { %v582_v19 = vpop.permute.xlu1 %581  ;;  %v3361_v52 = vmul.f32 %v2191_v39, %v3947_v60  ;;  %v3950_v40 = vmax.f32 %v3189_v1, %v3219_v53  ;;  %v3372_v45 = vmul.f32 0.01, %v3339_v24  ;;  %v3375_v60 = vadd.f32 %v2620_v50, %v662_v25 }
 0x242   : > { %3946 = vst [vmem:[#allocation15_spill] sm:$0xff] %v3349_v63  ;;  %2204 = vpow2.f32 %v1304_v17  ;;  %v1158_v20 = vsub.f32 %v3949_v5, %v1028_v57  ;;  %v2193_v59 = vpop.eup %2192  ;;  %v3951_v5 = vld [vmem:[#allocation22_spill] sm:$0xff]  ;;  %v3391_v25 = vadd.f32 %v2623_v51, %v582_v19  ;;  %v3954_v1 = vmax.f32 %v3212_v43, %v3241_v26 }
 0x243   : > { %3948 = vst [vmem:[#allocation16_spill] sm:$0xff] %v3361_v52  ;;  %v1159_v31 = vsub.f32 %v3950_v40, %v1028_v57  ;;  %2206 = vpow2.f32 %v1306_v0  ;;  %v1609_v39 = vadd.f32 %v3361_v52, %v3349_v63  ;;  %v2195_v35 = vpop.eup %2194  ;;  %v3380_v53 = vmul.f32 %v2193_v59, %v3951_v5  ;;  %v3957_v52 = vld [vmem:[#allocation25_spill] sm:$0xff] }
 0x244   : > { %v1240_v44 = vmul.f32 1.442695, %v1158_v20  ;;  %v3385_v57 = vmul.f32 0.01, %v3355_v47  ;;  %v3388_v0 = vmul.f32 0.01, %v3358_v27  ;;  %v1113_v40 = vpop.permute.xlu0 %1112  ;;  %v3953_v59 = vmax.f32 %v3198_v22, %v3225_v30 }
 0x245   : > { %v1242_v17 = vmul.f32 1.442695, %v1159_v31  ;;  %1610 = vadd.xlane.f32.xlu0 %v1609_v39  ;;  %v667_v16 = vpop.permute.xlu1 %666  ;;  %v3952_v20 = vld [vmem:[#allocation23_spill] sm:$0xff]  ;;  %v1193_v63 = vsub.f32 %v3954_v1, %v1113_v40  ;;  %v3405_v39 = vmul.f32 0.01, %v3375_v60  ;;  %v3412_v30 = vadd.f32 %v2620_v50, %v582_v19  ;;  %v3955_v1 = vld [vmem:[#allocation24_spill] sm:$0xff] }
 0x246   : > { %v3394_v31 = vmul.f32 %v2195_v35, %v3952_v20  ;;  %2208 = vpow2.f32 %v1240_v44  ;;  %v1192_v5 = vsub.f32 %v3953_v59, %v1113_v40  ;;  %v3418_v20 = vmul.f32 0.01, %v3391_v25 }
 0x247   : > { %v2197_v14 = vpop.eup %2196  ;;  %2210 = vpow2.f32 %v1242_v17  ;;  %v1310_v26 = vmul.f32 1.442695, %v1193_v63  ;;  %v3428_v63 = vadd.f32 %v2623_v51, %v667_v16  ;;  %v3445_v12 = vmul.f32 0.01, %v3412_v30 }
 0x248   : > { %v1561_v35 = vadd.f32 %v3394_v31, %v3380_v53  ;;  %v2199_v22 = vpop.eup %2198  ;;  %v1308_v43 = vmul.f32 1.442695, %v1192_v5  ;;  %v3415_v40 = vmul.f32 %v2197_v14, %v3955_v1  ;;  %v1033_v17 = vpop.permute.xlu0 %1032  ;;  %v3959_v14 = vmax.f32 %v3228_v48, %v3254_v21 }
 0x249   : > { %v587_v59 = vpop.permute.xlu1 %586  ;;  %v3421_v34 = vmul.f32 %v2199_v22, %v3957_v52  ;;  %v3437_v22 = vadd.f32 %v2620_v50, %v667_v16 }
 0x24a   : > { %3956 = vst [vmem:[#allocation17_spill] sm:$0xff] %v3415_v40  ;;  %1562 = vadd.xlane.f32.xlu1 %v1561_v35  ;;  %2212 = vpow2.f32 %v1308_v43  ;;  %v1160_v5 = vsub.f32 %v3959_v14, %v1033_v17  ;;  %v3960_v35 = vmax.f32 %v3244_v38, %v3274_v18  ;;  %v2201_v52 = vpop.eup %2200  ;;  %v3440_v44 = vadd.f32 %v2623_v51, %v587_v59  ;;  %v3961_v14 = vld [vmem:[#allocation26_spill] sm:$0xff] }
 0x24b   : > { %3958 = vst [vmem:[#allocation18_spill] sm:$0xff] %v3421_v34  ;;  %2214 = vpow2.f32 %v1310_v26  ;;  %v1612_v43 = vadd.f32 %v3421_v34, %v3415_v40  ;;  %v2203_v19 = vpop.eup %2202  ;;  %v3448_v38 = vmul.f32 %v2201_v52, %v3961_v14  ;;  %v3451_v18 = vadd.f32 %v2620_v50, %v587_v59 }
 0x24c   : > { %v1161_v1 = vsub.f32 %v3960_v35, %v1033_v17  ;;  %v1244_v48 = vmul.f32 1.442695, %v1160_v5  ;;  %v1118_v16 = vpop.permute.xlu0 %1117  ;;  %v3962_v17 = vld [vmem:[#allocation27_spill] sm:$0xff]  ;;  %v872_v40 = vmax.f32 %v3375_v60, %v3405_v39  ;;  %v3461_v5 = vmul.f32 0.01, %v3428_v63 }
 0x24d   : > { %1613 = vadd.xlane.f32.xlu0 %v1612_v43  ;;  %v672_v26 = vpop.permute.xlu1 %671  ;;  %v3454_v35 = vmul.f32 %v2203_v19, %v3962_v17  ;;  %v3963_v59 = vmax.f32 %v3257_v62, %v3287_v6  ;;  %v3964_v52 = vmax.f32 %v3265_v11, %v3298_v58  ;;  %v3470_v14 = vmul.f32 0.01, %v3437_v22  ;;  %v3965_v6 = vld [vmem:[#allocation28_spill] sm:$0xff] }
 0x24e   : > { %v1246_v21 = vmul.f32 1.442695, %v1161_v1  ;;  %2216 = vpow2.f32 %v1244_v48  ;;  %v3473_v60 = vmul.f32 0.01, %v3440_v44  ;;  %v3478_v62 = vadd.f32 %v2623_v51, %v672_v26 }
 0x24f   : > { %v1194_v1 = vsub.f32 %v3963_v59, %v1118_v16  ;;  %v1195_v43 = vsub.f32 %v3964_v52, %v1118_v16  ;;  %v2205_v19 = vpop.eup %2204  ;;  %v1564_v39 = vadd.f32 %v3454_v35, %v3448_v38  ;;  %v3484_v58 = vmul.f32 0.01, %v3451_v18  ;;  %v3967_v52 = vld [vmem:[#allocation29_spill] sm:$0xff] }
 0x250   : > { %2218 = vpow2.f32 %v1246_v21  ;;  %v2207_v48 = vpop.eup %2206  ;;  %v3481_v11 = vmul.f32 %v2205_v19, %v3965_v6  ;;  %v3487_v21 = vadd.f32 %v2620_v50, %v672_v26  ;;  %v1038_v16 = vpop.permute.xlu0 %1037  ;;  %v3969_v6 = vmax.f32 %v3290_v8, %v3320_v36  ;;  %v3970_v36 = vld [vmem:[#allocation30_spill] sm:$0xff] }
 0x251   : > { %v1312_v17 = vmul.f32 1.442695, %v1194_v1  ;;  %v1314_v34 = vmul.f32 1.442695, %v1195_v43  ;;  %1565 = vadd.xlane.f32.xlu1 %v1564_v39  ;;  %v592_v59 = vpop.permute.xlu1 %591  ;;  %v3490_v23 = vmul.f32 %v2207_v48, %v3967_v52  ;;  %v3968_v43 = vmax.f32 %v3277_v15, %v3307_v37 }
 0x252   : > { %3966 = vst [vmem:[#allocation19_spill] sm:$0xff] %v3481_v11  ;;  %v1163_v7 = vsub.f32 %v3969_v6, %v1038_v16  ;;  %v873_v26 = vmax.f32 %v3428_v63, %v3461_v5  ;;  %v874_v52 = vmax.f32 %v3437_v22, %v3470_v14  ;;  %v811_v15 = vmul.f32 0.01, %v3478_v62  ;;  %v3971_v22 = vld [vmem:[#allocation31_spill] sm:$0xff] }
 0x253   : > { %2220 = vpow2.f32 %v1312_v17  ;;  %v1162_v19 = vsub.f32 %v3968_v43, %v1038_v16  ;;  %v2209_v39 = vpop.eup %2208  ;;  %v1615_v48 = vadd.f32 %v3490_v23, %v3481_v11  ;;  %v812_v63 = vmul.f32 0.01, %v3487_v21  ;;  %v3975_v11 = vld [vmem:[#allocation32_spill] sm:$0xff] }
 0x254   : > { %2222 = vpow2.f32 %v1314_v34  ;;  %v2211_v37 = vpop.eup %2210  ;;  %v1250_v8 = vmul.f32 1.442695, %v1163_v7  ;;  %v3510_v16 = vmul.f32 %v2209_v39, %v3970_v36  ;;  %v3514_v34 = vadd.f32 %v2623_v51, %v592_v59  ;;  %v1123_v5 = vpop.permute.xlu0 %1122 }
 0x255   : > { %v1248_v43 = vmul.f32 1.442695, %v1162_v19  ;;  %1616 = vadd.xlane.f32.xlu0 %v1615_v48  ;;  %v1128_v6 = vpop.permute.xlu1 %1127  ;;  %v3517_v14 = vmul.f32 %v2211_v37, %v3971_v22  ;;  %v3972_v7 = vmax.f32 %v3314_v9, %v3346_v32  ;;  %v3973_v39 = vmax.f32 %v3323_v54, %v3352_v28 }
 0x256   : > { %v3974_v51 = vmax.f32 %v3358_v27, %v3388_v0  ;;  %v3531_v37 = vadd.f32 %v2620_v50, %v592_v59  ;;  %v1199_v22 = vsub.f32 %v872_v40, %v1128_v6  ;;  %v3539_v28 = vmul.f32 0.01, %v3514_v34 }
 0x257   : > { %2224 = vpow2.f32 %v1248_v43  ;;  %v1196_v19 = vsub.f32 %v3972_v7, %v1123_v5  ;;  %v1197_v36 = vsub.f32 %v3973_v39, %v1123_v5  ;;  %v2213_v1 = vpop.eup %2212  ;;  %v1567_v43 = vadd.f32 %v3517_v14, %v3510_v16 }
 0x258   : > { %v1198_v48 = vsub.f32 %v3974_v51, %v1128_v6  ;;  %2226 = vpow2.f32 %v1250_v8  ;;  %v2215_v17 = vpop.eup %2214  ;;  %v3536_v54 = vmul.f32 %v2213_v1, %v3975_v11  ;;  %v1322_v27 = vmul.f32 1.442695, %v1199_v22  ;;  %v1043_v0 = vpop.permute.xlu0 %1042 }
 0x259   : > { %v1316_v9 = vmul.f32 1.442695, %v1196_v19  ;;  %v1318_v32 = vmul.f32 1.442695, %v1197_v36  ;;  %1568 = vadd.xlane.f32.xlu1 %v1567_v43  ;;  %v1133_v8 = vpop.permute.xlu1 %1132  ;;  %v3542_v50 = vmul.f32 %v2215_v17, %v2832_v49  ;;  %v875_v40 = vmax.f32 %v3478_v62, %v811_v15 }
 0x25a   : > { %v1320_v7 = vmul.f32 1.442695, %v1198_v48  ;;  %v3976_v59 = vmax.f32 %v3339_v24, %v3372_v45  ;;  %v3977_v11 = vmax.f32 %v3355_v47, %v3385_v57  ;;  %v1200_v6 = vsub.f32 %v873_v26, %v1133_v8 }
 0x25b   : > { %2228 = vpow2.f32 %v1316_v9  ;;  %v2217_v19 = vpop.eup %2216  ;;  %v1201_v39 = vsub.f32 %v874_v52, %v1133_v8  ;;  %v1618_v36 = vadd.f32 %v3542_v50, %v3536_v54  ;;  %v876_v49 = vmax.f32 %v3487_v21, %v812_v63 }
 0x25c   : > { %v1164_v5 = vsub.f32 %v3976_v59, %v1043_v0  ;;  %v1165_v1 = vsub.f32 %v3977_v11, %v1043_v0  ;;  %2230 = vpow2.f32 %v1318_v32  ;;  %v1324_v51 = vmul.f32 1.442695, %v1200_v6  ;;  %v1048_v45 = vpop.permute.xlu0 %1047 }
 0x25d   : > { %v2219_v17 = vpop.eup %2218  ;;  %2232 = vpow2.f32 %v1320_v7  ;;  %v1326_v24 = vmul.f32 1.442695, %v1201_v39  ;;  %1619 = vadd.xlane.f32.xlu0 %v1618_v36  ;;  %v1138_v47 = vpop.permute.xlu1 %1137  ;;  %v3555_v57 = vmul.f32 %v2217_v19, %v2837_v56  ;;  %v3978_v21 = vmax.f32 %v3391_v25, %v3418_v20 }
 0x25e   : > { %v1252_v62 = vmul.f32 1.442695, %v1164_v5  ;;  %v1254_v15 = vmul.f32 1.442695, %v1165_v1  ;;  %2234 = vpow2.f32 %v1322_v27  ;;  %v3558_v26 = vmul.f32 %v2219_v17, %v2840_v13  ;;  %v3569_v13 = vld [vmem:[#allocation4 + $0x30] sm:$0xff]  ;;  %v3583_v1 = vld [vmem:[#allocation4 + $0x38] sm:$0xff] }
 0x25f   : > { %v1166_v52 = vsub.f32 %v3978_v21, %v1048_v45  ;;  %v3979_v63 = vmax.f32 %v3412_v30, %v3445_v12  ;;  %v1202_v22 = vsub.f32 %v875_v40, %v1138_v47  ;;  %v780_v9 = vmul.f32 0.01, %v3531_v37 }
 0x260   : > { %2236 = vpow2.f32 %v1252_v62  ;;  %v2221_v43 = vpop.eup %2220  ;;  %v1203_v32 = vsub.f32 %v876_v49, %v1138_v47  ;;  %v1570_v56 = vadd.f32 %v3558_v26, %v3555_v57  ;;  %v1053_v12 = vpop.permute.xlu0 %1052  ;;  %v3980_v40 = vmax.f32 %v3440_v44, %v3473_v60  ;;  %v2324_v62 = vld [vmem:[#allocation4 + $0x70] sm:$0xff] }
 0x261   : > { %v1167_v48 = vsub.f32 %v3979_v63, %v1048_v45  ;;  %2238 = vpow2.f32 %v1254_v15  ;;  %v2223_v7 = vpop.eup %2222  ;;  %v1256_v27 = vmul.f32 1.442695, %v1166_v52  ;;  %v1328_v20 = vmul.f32 1.442695, %v1202_v22 }
 0x262   : > { %2240 = vpow2.f32 %v1324_v51  ;;  %v1330_v0 = vmul.f32 1.442695, %v1203_v32  ;;  %1571 = vadd.xlane.f32.xlu1 %v1570_v56  ;;  %v3572_v30 = vmul.f32 %v2221_v43, %v2847_v46  ;;  %v3575_v8 = vmul.f32 %v2223_v7, %v2849_v42  ;;  %v3984_v32 = vld [vmem:[#allocation34_spill] sm:$0xff] }
 0x263   : > { %v1258_v25 = vmul.f32 1.442695, %v1167_v48  ;;  %2242 = vpow2.f32 %v1326_v24  ;;  %v1168_v59 = vsub.f32 %v3980_v40, %v1053_v12  ;;  %v3981_v5 = vmax.f32 %v3451_v18, %v3484_v58  ;;  %v3983_v48 = vld [vmem:[#allocation33_spill] sm:$0xff] }
 0x264   : > { %2244 = vpow2.f32 %v1256_v27  ;;  %v1372_v6 = vunpack.c.0.s8 %v3569_v13  ;;  %v2225_v19 = vpop.eup %2224  ;;  %v1621_v46 = vadd.f32 %v3575_v8, %v3572_v30  ;;  %v843_v42 = vmax.f32 %v3514_v34, %v3539_v28  ;;  %v1058_v58 = vpop.permute.xlu0 %1057  ;;  %v2325_v28 = vld [vmem:[#allocation4 + $0x78] sm:$0xff] }
 0x265   : > { %v1169_v11 = vsub.f32 %v3981_v5, %v1053_v12  ;;  %2246 = vpow2.f32 %v1258_v25  ;;  %v844_v39 = vmax.f32 %v3531_v37, %v780_v9  ;;  %v2227_v44 = vpop.eup %2226  ;;  %v1260_v60 = vmul.f32 1.442695, %v1168_v59  ;;  %v3985_v5 = vld [vmem:[#allocation35_spill] sm:$0xff] }
 0x266   : > { %2248 = vpow2.f32 %v1328_v20  ;;  %v3592_v18 = vmul.f32 %v2225_v19, %v2867_v2  ;;  %1622 = vadd.xlane.f32.xlu0 %v1621_v46  ;;  %v3595_v49 = vmul.f32 %v2227_v44, %v2870_v29  ;;  %v1373_v17 = vunpack.c.0.s8 %v3583_v1 }
 0x267   : > { %v1262_v36 = vmul.f32 1.442695, %v1169_v11  ;;  %2250 = vpow2.f32 %v1330_v0  ;;  %v1408_v15 = vunpack.c.2.s8 %v2324_v62  ;;  %v1170_v34 = vsub.f32 %v843_v42, %v1058_v58 }
 0x268   : > { %2252 = vpow2.f32 %v1260_v60  ;;  %v1171_v37 = vsub.f32 %v844_v39, %v1058_v58  ;;  %v1409_v51 = vunpack.c.2.s8 %v2325_v28  ;;  %v2229_v24 = vpop.eup %2228  ;;  %v1573_v2 = vadd.f32 %v3595_v49, %v3592_v18 }
 0x269   : > { %2254 = vpow2.f32 %v1262_v36  ;;  %v1436_v45 = vcvt.s32.f32 %v1372_v6  ;;  %v3982_v47 = vunpack.c.1.s8 %v2853_v33  ;;  %v2231_v29 = vpop.eup %2230  ;;  %v1264_v52 = vmul.f32 1.442695, %v1170_v34 }
 0x26a   : > { %v1266_v63 = vmul.f32 1.442695, %v1171_v37  ;;  %v3603_v22 = vmul.f32 %v2229_v24, %v3983_v48  ;;  %v1374_v43 = vunpack.c.1.s8 %v3569_v13  ;;  %v2233_v9 = vpop.eup %2232  ;;  %1574 = vadd.xlane.f32.xlu1 %v1573_v2  ;;  %v3607_v56 = vmul.f32 %v2231_v29, %v3984_v32 }
 0x26b   : > { %v1471_v21 = vcvt.s32.f32 %v3982_v47  ;;  %v1437_v7 = vcvt.s32.f32 %v1373_v17  ;;  %v1375_v27 = vunpack.c.1.s8 %v3583_v1  ;;  %v1472_v25 = vcvt.s32.f32 %v1408_v15  ;;  %v2235_v20 = vpop.eup %2234 }
 0x26c   : > { %2256 = vpow2.f32 %v1264_v52  ;;  %v1473_v33 = vcvt.s32.f32 %v1409_v51  ;;  %v1410_v0 = vunpack.c.3.s8 %v2324_v62  ;;  %v1411_v12 = vunpack.c.3.s8 %v2325_v28 }
 0x26d   : > { %v2237_v40 = vpop.eup %2236  ;;  %2258 = vpow2.f32 %v1266_v63  ;;  %v1624_v59 = vadd.f32 %v3607_v56, %v3603_v22  ;;  %v3613_v11 = vmul.f32 %v2233_v9, %v3985_v5  ;;  %v3615_v6 = vmul.f32 %v2235_v20, %v1471_v21 }
 0x26e   : > { %v2239_v19 = vpop.eup %2238  ;;  %v3617_v46 = vmul.f32 %v2237_v40, %v1436_v45  ;;  %v1438_v42 = vcvt.s32.f32 %v1374_v43  ;;  %v1376_v39 = vunpack.c.2.s8 %v3569_v13  ;;  %v1439_v36 = vcvt.s32.f32 %v1375_v27 }
 0x26f   : > { %v2241_v44 = vpop.eup %2240  ;;  %1625 = vadd.xlane.f32.xlu0 %v1624_v59  ;;  %v1501_v60 = vmul.f32 %v2239_v19, %v1437_v7  ;;  %v1377_v58 = vunpack.c.2.s8 %v3583_v1  ;;  %v1474_v62 = vcvt.s32.f32 %v1410_v0  ;;  %v1475_v15 = vcvt.s32.f32 %v1411_v12 }
 0x270   : > { %v2243_v17 = vpop.eup %2242  ;;  %v1627_v28 = vadd.f32 %v3615_v6, %v3613_v11  ;;  %v3624_v51 = vmul.f32 %v2241_v44, %v1472_v25  ;;  %v1440_v47 = vcvt.s32.f32 %v1376_v39  ;;  %v1378_v21 = vunpack.c.3.s8 %v3569_v13  ;;  %v4002_v44 = vld [vmem:[#allocation11_spill] sm:$0xff] }
 0x271   : > { %v2245_v34 = vpop.eup %2244  ;;  %v1576_v37 = vadd.f32 %v1501_v60, %v3617_v46  ;;  %v3626_v24 = vmul.f32 %v2243_v17, %v1473_v33  ;;  %v1441_v63 = vcvt.s32.f32 %v1377_v58  ;;  %v1379_v48 = vunpack.c.3.s8 %v3583_v1  ;;  %v4004_v58 = vld [vmem:[#allocation52_spill] sm:$0xff] }
 0x272   : > { %v2247_v2 = vpop.eup %2246  ;;  %v1502_v45 = vmul.f32 %v2245_v34, %v1438_v42  ;;  %v1442_v13 = vcvt.s32.f32 %v1378_v21  ;;  %v4006_v34 = vld [vmem:[#allocation48_spill] sm:$0xff] }
 0x273   : > { %v2249_v29 = vpop.eup %2248  ;;  %1577 = vadd.xlane.f32.xlu1 %v1576_v37  ;;  %1628 = vadd.xlane.f32.xlu0 %v1627_v28  ;;  %v1503_v52 = vmul.f32 %v2247_v2, %v1439_v36  ;;  %v1630_v7 = vadd.f32 %v3626_v24, %v3624_v51  ;;  %v1443_v12 = vcvt.s32.f32 %v1379_v48  ;;  %v4003_v36 = vld [vmem:[#allocation53_spill] sm:$0xff] }
 0x274   : > { %v2251_v43 = vpop.eup %2250  ;;  %v3632_v27 = vmul.f32 %v2249_v29, %v1474_v62  ;;  %v4005_v62 = vld [vmem:[#allocation49_spill] sm:$0xff] }
 0x275   : > { %v2253_v9 = vpop.eup %2252  ;;  %v1579_v32 = vadd.f32 %v1503_v52, %v1502_v45  ;;  %v3634_v25 = vmul.f32 %v2251_v43, %v1475_v15  ;;  %v4007_v28 = vld [vmem:[#allocation45_spill] sm:$0xff] }
 0x276   : > { %v2255_v20 = vpop.eup %2254  ;;  %v1504_v33 = vmul.f32 %v2253_v9, %v1440_v47  ;;  %v4009_v2 = vld [vmem:[#allocation41_spill] sm:$0xff]  ;;  %v4010_v47 = vld [vmem:[#allocation40_spill] sm:$0xff] }
 0x277   : > { %1580 = vadd.xlane.f32.xlu1 %v1579_v32  ;;  %1631 = vadd.xlane.f32.xlu0 %v1630_v7  ;;  %v1505_v0 = vmul.f32 %v2255_v20, %v1441_v63  ;;  %v1633_v1 = vadd.f32 %v3634_v25, %v3632_v27  ;;  %v4011_v29 = vld [vmem:[#allocation37_spill] sm:$0xff] }
 0x279   : > { %v2257_v40 = vpop.eup %2256  ;;  %v1582_v59 = vadd.f32 %v1505_v0, %v1504_v33 }
 0x27a   : > { %v2259_v5 = vpop.eup %2258  ;;  %v1506_v19 = vmul.f32 %v2257_v40, %v1442_v13 }
 0x27b   : > { %1583 = vadd.xlane.f32.xlu1 %v1582_v59  ;;  %1634 = vadd.xlane.f32.xlu0 %v1633_v1  ;;  %v1507_v42 = vmul.f32 %v2259_v5, %v1443_v12 }
 0x27d   : > { %1756 = vmatprep.subr.mxu0 %v1507_v42  ;;  %1993 = vmatprep.subr.mxu1 %v1507_v42  ;;  %v1585_v39 = vadd.f32 %v1507_v42, %v1506_v19 }
 0x27e   : > { %1757 = vmatpush1.msra.mxu0 %v1506_v19  ;;  %2025 = vmatpush1.msra.mxu1 %v1506_v19 }
 0x27f   : > { %1758 = vmatprep.subr.mxu0 %v1505_v0  ;;  %1994 = vmatprep.subr.mxu1 %v1505_v0 }
 0x280   : > { %1586 = vadd.xlane.f32.xlu1 %v1585_v39  ;;  %1759 = vmatpush1.msra.mxu0 %v1504_v33 }
 0x281   : > { %2026 = vmatpush1.msra.mxu1 %v1504_v33  ;;  %1760 = vmatprep.subr.mxu0 %v1503_v52 }
 0x282   : > { %1995 = vmatprep.subr.mxu1 %v1503_v52  ;;  %1761 = vmatpush1.msra.mxu0 %v1502_v45  ;;  %v4012_v52 = vld [vmem:[#allocation36_spill] sm:$0xff] }
 0x283   : > { %2027 = vmatpush1.msra.mxu1 %v1502_v45  ;;  %1762 = vmatprep.subr.mxu0 %v1501_v60 }
 0x284   : > { %1996 = vmatprep.subr.mxu1 %v1501_v60  ;;  %1763 = vmatpush1.msra.mxu0 %v3617_v46 }
 0x285   : > { %2028 = vmatpush1.msra.mxu1 %v3617_v46  ;;  %1764 = vmatprep.subr.mxu0 %v3595_v49 }
 0x286   : > { %1997 = vmatprep.subr.mxu1 %v3595_v49  ;;  %1765 = vmatpush1.msra.mxu0 %v3592_v18  ;;  %v3997_v49 = vld [vmem:[#allocation16_spill] sm:$0xff] }
 0x287   : > { %2029 = vmatpush1.msra.mxu1 %v3592_v18  ;;  %1766 = vmatprep.subr.mxu0 %v3558_v26  ;;  %v3996_v18 = vld [vmem:[#allocation17_spill] sm:$0xff] }
 0x288   : > { %1998 = vmatprep.subr.mxu1 %v3558_v26  ;;  %1767 = vmatpush1.msra.mxu0 %v3555_v57 }
 0x289   : > { %2030 = vmatpush1.msra.mxu1 %v3555_v57  ;;  %1768 = vmatprep.subr.mxu0 %v3517_v14 }
 0x28a   : > { %1999 = vmatprep.subr.mxu1 %v3517_v14  ;;  %1769 = vmatpush1.msra.mxu0 %v3510_v16 }
 0x28b   : > { %2031 = vmatpush1.msra.mxu1 %v3510_v16  ;;  %1770 = vmatprep.subr.mxu0 %v3454_v35 }
 0x28c   : > { %2000 = vmatprep.subr.mxu1 %v3454_v35  ;;  %1771 = vmatpush1.msra.mxu0 %v3448_v38 }
 0x28d   : > { %2032 = vmatpush1.msra.mxu1 %v3448_v38  ;;  %1772 = vmatprep.subr.mxu0 %v3394_v31  ;;  %v3993_v38 = vld [vmem:[#allocation38_spill] sm:$0xff] }
 0x28e   : > { %2001 = vmatprep.subr.mxu1 %v3394_v31  ;;  %1773 = vmatpush1.msra.mxu0 %v3380_v53  ;;  %v3992_v31 = vld [vmem:[#allocation39_spill] sm:$0xff] }
 0x28f   : > { %2033 = vmatpush1.msra.mxu1 %v3380_v53  ;;  %1774 = vmatprep.subr.mxu0 %v3326_v61  ;;  %v3989_v53 = vld [vmem:[#allocation46_spill] sm:$0xff] }
 0x290   : > { %2002 = vmatprep.subr.mxu1 %v3326_v61  ;;  %1775 = vmatpush1.msra.mxu0 %v3317_v4  ;;  %v3986_v61 = vld [vmem:[#allocation51_spill] sm:$0xff] }
 0x291   : > { %2034 = vmatpush1.msra.mxu1 %v3317_v4  ;;  %1776 = vmatprep.subr.mxu0 %v3260_v10  ;;  %v3987_v4 = vld [vmem:[#allocation50_spill] sm:$0xff] }
 0x292   : > { %2003 = vmatprep.subr.mxu1 %v3260_v10  ;;  %1777 = vmatpush1.msra.mxu0 %v3249_v41  ;;  %v3988_v10 = vld [vmem:[#allocation47_spill] sm:$0xff] }
 0x293   : > { %2035 = vmatpush1.msra.mxu1 %v3249_v41  ;;  %1778 = vmatprep.subr.mxu0 %v3201_v3 }
 0x294   : > { %2004 = vmatprep.subr.mxu1 %v3201_v3  ;;  %1779 = vmatpush1.msra.mxu0 %v3192_v55  ;;  %v3990_v3 = vld [vmem:[#allocation43_spill] sm:$0xff] }
 0x295   : > { %2036 = vmatpush1.msra.mxu1 %v3192_v55  ;;  %1780 = vmatprep.subr.mxu0 %v3986_v61  ;;  %v1590_v41 = vpop.xlane.xlu1 %1589  ;;  %v3991_v55 = vld [vmem:[#allocation42_spill] sm:$0xff] }
 0x296   : > { %2005 = vmatprep.subr.mxu1 %v3986_v61  ;;  %1781 = vmatpush1.msra.mxu0 %v3987_v4  ;;  %2260 = vrcp.f32 %v1590_v41 }
 0x297   : > { %2037 = vmatpush1.msra.mxu1 %v3987_v4  ;;  %1782 = vmatprep.subr.mxu0 %v3988_v10 }
 0x298   : > { %2006 = vmatprep.subr.mxu1 %v3988_v10  ;;  %1783 = vmatpush1.msra.mxu0 %v3989_v53 }
 0x299   : > { %2038 = vmatpush1.msra.mxu1 %v3989_v53  ;;  %1784 = vmatprep.subr.mxu0 %v3990_v3  ;;  %v1542_v35 = vpop.xlane.xlu0 %1541 }
 0x29a   : > { %2007 = vmatprep.subr.mxu1 %v3990_v3  ;;  %1785 = vmatpush1.msra.mxu0 %v3991_v55 }
 0x29b   : > { %2039 = vmatpush1.msra.mxu1 %v3991_v55  ;;  %1786 = vmatprep.subr.mxu0 %v3992_v31 }
 0x29c   : > { %2008 = vmatprep.subr.mxu1 %v3992_v31  ;;  %1787 = vmatpush1.msra.mxu0 %v3993_v38 }
 0x29d   : > { %2040 = vmatpush1.msra.mxu1 %v3993_v38  ;;  %1788 = vmatprep.subr.mxu0 %v3634_v25  ;;  %v1593_v16 = vpop.xlane.xlu0 %1592 }
 0x29e   : > { %2009 = vmatprep.subr.mxu1 %v3634_v25  ;;  %1789 = vmatpush2.msra.mxu0 %v3632_v27  ;;  %2262 = vrcp.f32 %v1593_v16 }
 0x29f   : > { %2041 = vmatpush2.msra.mxu1 %v3632_v27  ;;  %1790 = vmatprep.subr.mxu0 %v3626_v24  ;;  %2264 = vrcp.f32 %v1542_v35 }
 0x2a0   : > { %2010 = vmatprep.subr.mxu1 %v3626_v24  ;;  %1791 = vmatpush2.msra.mxu0 %v3624_v51 }
 0x2a1   : > { %2042 = vmatpush2.msra.mxu1 %v3624_v51  ;;  %1792 = vmatprep.subr.mxu0 %v3615_v6  ;;  %v1545_v57 = vpop.xlane.xlu1 %1544  ;;  %v4008_v51 = vld [vmem:[#allocation44_spill] sm:$0xff] }
 0x2a2   : > { %2011 = vmatprep.subr.mxu1 %v3615_v6  ;;  %1793 = vmatpush2.msra.mxu0 %v3613_v11  ;;  %v4001_v6 = vld [vmem:[#allocation12_spill] sm:$0xff] }
 0x2a3   : > { %2043 = vmatpush2.msra.mxu1 %v3613_v11  ;;  %1794 = vmatprep.subr.mxu0 %v3607_v56  ;;  %v2261_v14 = vpop.eup %2260  ;;  %v4000_v11 = vld [vmem:[#allocation13_spill] sm:$0xff] }
 0x2a4   : > { %2012 = vmatprep.subr.mxu1 %v3607_v56  ;;  %1795 = vmatpush2.msra.mxu0 %v3603_v22 }
 0x2a5   : > { %2044 = vmatpush2.msra.mxu1 %v3603_v22  ;;  %1796 = vmatprep.subr.mxu0 %v3575_v8  ;;  %v1596_v26 = vpop.xlane.xlu0 %1595  ;;  %v3999_v22 = vld [vmem:[#allocation14_spill] sm:$0xff] }
 0x2a6   : > { %2013 = vmatprep.subr.mxu1 %v3575_v8  ;;  %1797 = vmatpush2.msra.mxu0 %v3572_v30  ;;  %2266 = vrcp.f32 %v1596_v26  ;;  %v3994_v8 = vld [vmem:[#allocation19_spill] sm:$0xff] }
 0x2a7   : > { %2045 = vmatpush2.msra.mxu1 %v3572_v30  ;;  %1798 = vmatprep.subr.mxu0 %v3542_v50  ;;  %2268 = vrcp.f32 %v1545_v57  ;;  %v3995_v30 = vld [vmem:[#allocation18_spill] sm:$0xff] }
 0x2a8   : > { %2014 = vmatprep.subr.mxu1 %v3542_v50  ;;  %1799 = vmatpush2.msra.mxu0 %v3536_v54 }
 0x2a9   : > { %2046 = vmatpush2.msra.mxu1 %v3536_v54  ;;  %1700 = vxpose.xlu0.b32.start [1/16] (narrow) %v2261_v14, 8  ;;  %v1548_v50 = vpop.xlane.xlu1 %1547 }
 0x2aa   : > { %1800 = vmatprep.subr.mxu0 %v3490_v23  ;;  %2015 = vmatprep.subr.mxu1 %v3490_v23  ;;  %2270 = vrcp.f32 %v1548_v50  ;;  %v3998_v23 = vld [vmem:[#allocation15_spill] sm:$0xff] }
 0x2ab   : > { %1801 = vmatpush2.msra.mxu0 %v3994_v8  ;;  %2047 = vmatpush2.msra.mxu1 %v3994_v8  ;;  %v2263_v54 = vpop.eup %2262 }
 0x2ac   : > { %1802 = vmatprep.subr.mxu0 %v3995_v30  ;;  %2016 = vmatprep.subr.mxu1 %v3995_v30  ;;  %v2265_v46 = vpop.eup %2264 }
 0x2ad   : > { %1803 = vmatpush2.msra.mxu0 %v3996_v18  ;;  %2048 = vmatpush2.msra.mxu1 %v3996_v18  ;;  %v1599_v56 = vpop.xlane.xlu0 %1598 }
 0x2ae   : > { %1804 = vmatprep.subr.mxu0 %v3997_v49  ;;  %2017 = vmatprep.subr.mxu1 %v3997_v49  ;;  %2272 = vrcp.f32 %v1599_v56 }
 0x2af   : > { %1805 = vmatpush2.msra.mxu0 %v3998_v23  ;;  %2049 = vmatpush2.msra.mxu1 %v3998_v23 }
 0x2b0   : > { %1806 = vmatprep.subr.mxu0 %v3999_v22  ;;  %2018 = vmatprep.subr.mxu1 %v3999_v22 }
 0x2b1   : > { %1701 = vxpose.xlu0.b32.cont [2/16] (narrow) %v2263_v54, 8  ;;  %1807 = vmatpush2.msra.mxu0 %v4000_v11  ;;  %v1551_v60 = vpop.xlane.xlu1 %1550 }
 0x2b2   : > { %2050 = vmatpush2.msra.mxu1 %v4000_v11  ;;  %1808 = vmatprep.subr.mxu0 %v4001_v6  ;;  %2274 = vrcp.f32 %v1551_v60  ;;  %v413_v60 = vpop.f32.mrf.mxu0 }
 0x2b3   : > { %2019 = vmatprep.subr.mxu1 %v4001_v6  ;;  %1809 = vmatpush2.msra.mxu0 %v4002_v44  ;;  %v2267_v17 = vpop.eup %2266 }
 0x2b4   : > { %2051 = vmatpush2.msra.mxu1 %v4002_v44  ;;  %1668 = vxpose.xlu1.b32.start [1/16] (narrow) %v2265_v46, 8  ;;  %v2269_v15 = vpop.eup %2268 }
 0x2b5   : > { %1810 = vmatprep.subr.mxu0 %v4003_v36  ;;  %2020 = vmatprep.subr.mxu1 %v4003_v36  ;;  %v1602_v37 = vpop.xlane.xlu0 %1601  ;;  %v415_v36 = vpop.f32.mrf.mxu0 }
 0x2b6   : > { %1811 = vmatpush2.msra.mxu0 %v4004_v58  ;;  %2052 = vmatpush2.msra.mxu1 %v4004_v58  ;;  %2276 = vrcp.f32 %v1602_v37 }
 0x2b7   : > { %1812 = vmatprep.subr.mxu0 %v4005_v62  ;;  %2021 = vmatprep.subr.mxu1 %v4005_v62  ;;  %v2271_v24 = vpop.eup %2270 }
 0x2b8   : > { %1813 = vmatpush2.msra.mxu0 %v4006_v34  ;;  %2053 = vmatpush2.msra.mxu1 %v4006_v34  ;;  %v4013_v34 = vld [vmem:[#allocation10_spill] sm:$0xff] }
 0x2b9   : > { %1669 = vxpose.xlu1.b32.cont [2/16] (narrow) %v2269_v15, 8  ;;  %1814 = vmatprep.subr.mxu0 %v4007_v28  ;;  %v1554_v45 = vpop.xlane.xlu1 %1553 }
 0x2ba   : > { %2022 = vmatprep.subr.mxu1 %v4007_v28  ;;  %1702 = vxpose.xlu0.b32.cont [3/16] (narrow) %v2267_v17, 8  ;;  %2278 = vrcp.f32 %v1554_v45 }
 0x2bb   : > { %1815 = vmatpush2.msra.mxu0 %v4008_v51  ;;  %2054 = vmatpush2.msra.mxu1 %v4008_v51  ;;  %v2273_v21 = vpop.eup %2272 }
 0x2bc   : > { %1816 = vmatprep.subr.mxu0 %v4009_v2  ;;  %2023 = vmatprep.subr.mxu1 %v4009_v2 }
 0x2bd   : > { %1817 = vmatpush2.msra.mxu0 %v4010_v47  ;;  %2055 = vmatpush2.msra.mxu1 %v4010_v47  ;;  %v1605_v63 = vpop.xlane.xlu0 %1604 }
 0x2be   : > { %1818 = vmatprep.subr.mxu0 %v4011_v29  ;;  %2024 = vmatprep.subr.mxu1 %v4011_v29  ;;  %2280 = vrcp.f32 %v1605_v63 }
 0x2bf   : > { %1670 = vxpose.xlu1.b32.cont [3/16] (narrow) %v2271_v24, 8  ;;  %1819 = vmatpush2.msra.mxu0 %v4012_v52  ;;  %v2275_v48 = vpop.eup %2274 }
 0x2c0   : > { %2056 = vmatpush2.msra.mxu1 %v4012_v52  ;;  %1703 = vxpose.xlu0.b32.cont [4/16] (narrow) %v2273_v21, 8 }
 0x2c1   : > { %v1557_v43 = vpop.xlane.xlu1 %1556 }
 0x2c2   : > { %2282 = vrcp.f32 %v1557_v43 }
 0x2c3   : > { %1671 = vxpose.xlu1.b32.cont [4/16] (narrow) %v2275_v48, 8  ;;  %v2277_v9 = vpop.eup %2276 }
 0x2c4   : > { %1704 = vxpose.xlu0.b32.cont [5/16] (narrow) %v2277_v9, 8 }
 0x2c5   : > { %v1608_v32 = vpop.xlane.xlu0 %1607 }
 0x2c6   : > { %2284 = vrcp.f32 %v1608_v32 }
 0x2c7   : > { %v2279_v7 = vpop.eup %2278 }
 0x2c8   : > { %1672 = vxpose.xlu1.b32.cont [5/16] (narrow) %v2279_v7, 8 }
 0x2c9   : > { %v1560_v27 = vpop.xlane.xlu1 %1559 }
 0x2ca   : > { %2286 = vrcp.f32 %v1560_v27 }
 0x2cb   : > { %v2281_v25 = vpop.eup %2280 }
 0x2cc   : > { %1705 = vxpose.xlu0.b32.cont [6/16] (narrow) %v2281_v25, 8  ;;  %v419_v58 = vpop.f32.mrf.mxu0 }
 0x2ce   : > { %v1611_v20 = vpop.xlane.xlu0 %1610  ;;  %v421_v17 = vpop.f32.mrf.mxu0 }
 0x2cf   : > { %2288 = vrcp.f32 %v1611_v20  ;;  %v2283_v33 = vpop.eup %2282 }
 0x2d0   : > { %1673 = vxpose.xlu1.b32.cont [6/16] (narrow) %v2283_v33, 8  ;;  %v425_v62 = vpop.f32.mrf.mxu0 }
 0x2d2   : > { %v427_v28 = vpop.f32.mrf.mxu0 }
 0x2d3   : > { %v1563_v13 = vpop.xlane.xlu1 %1562  ;;  %v2285_v0 = vpop.eup %2284 }
 0x2d4   : > { %2290 = vrcp.f32 %v1563_v13  ;;  %1706 = vxpose.xlu0.b32.cont [7/16] (narrow) %v2285_v0, 8  ;;  %v431_v45 = vpop.f32.mrf.mxu0 }
 0x2d6   : > { %v1614_v12 = vpop.xlane.xlu0 %1613  ;;  %v433_v63 = vpop.f32.mrf.mxu0 }
 0x2d7   : > { %2292 = vrcp.f32 %v1614_v12  ;;  %v2287_v40 = vpop.eup %2286 }
 0x2d8   : > { %1674 = vxpose.xlu1.b32.cont [7/16] (narrow) %v2287_v40, 8 }
 0x2da   : > { %v1566_v59 = vpop.xlane.xlu1 %1565 }
 0x2db   : > { %2294 = vrcp.f32 %v1566_v59 }
 0x2dc   : > { %v2289_v1 = vpop.eup %2288 }
 0x2dd   : > { %1707 = vxpose.xlu0.b32.cont [8/16] (narrow) %v2289_v1, 8 }
 0x2de   : > { %v1617_v5 = vpop.xlane.xlu0 %1616 }
 0x2df   : > { %2296 = vrcp.f32 %v1617_v5 }
 0x2e1   : > { %v2291_v19 = vpop.eup %2290 }
 0x2e2   : > { %1675 = vxpose.xlu1.b32.cont [8/16] (narrow) %v2291_v19, 8  ;;  %v1569_v42 = vpop.xlane.xlu1 %1568 }
 0x2e3   : > { %2298 = vrcp.f32 %v1569_v42 }
 0x2e4   : > { %v2293_v39 = vpop.eup %2292 }
 0x2e5   : > { %1708 = vxpose.xlu0.b32.cont [9/16] (narrow) %v2293_v39, 8 }
 0x2e6   : > { %v1620_v61 = vpop.xlane.xlu0 %1619 }
 0x2e7   : > { %2300 = vrcp.f32 %v1620_v61 }
 0x2e8   : > { %v2295_v4 = vpop.eup %2294 }
 0x2e9   : > { %1676 = vxpose.xlu1.b32.cont [9/16] (narrow) %v2295_v4, 8 }
 0x2eb   : > { %v1572_v10 = vpop.xlane.xlu1 %1571 }
 0x2ec   : > { %2302 = vrcp.f32 %v1572_v10  ;;  %v2297_v41 = vpop.eup %2296 }
 0x2ed   : > { %1709 = vxpose.xlu0.b32.cont [10/16] (narrow) %v2297_v41, 8 }
 0x2ef   : > { %v1623_v53 = vpop.xlane.xlu0 %1622 }
 0x2f0   : > { %2304 = vrcp.f32 %v1623_v53  ;;  %v2299_v3 = vpop.eup %2298 }
 0x2f1   : > { %1677 = vxpose.xlu1.b32.cont [10/16] (narrow) %v2299_v3, 8 }
 0x2f3   : > { %v1575_v55 = vpop.xlane.xlu1 %1574 }
 0x2f4   : > { %2306 = vrcp.f32 %v1575_v55  ;;  %v2301_v31 = vpop.eup %2300 }
 0x2f5   : > { %1710 = vxpose.xlu0.b32.cont [11/16] (narrow) %v2301_v31, 8 }
 0x2f8   : > { %v1626_v38 = vpop.xlane.xlu0 %1625 }
 0x2f9   : > { %2308 = vrcp.f32 %v1626_v38  ;;  %v2303_v35 = vpop.eup %2302 }
 0x2fa   : > { %1678 = vxpose.xlu1.b32.cont [11/16] (narrow) %v2303_v35, 8 }
 0x2fc   : > { %v1578_v16 = vpop.xlane.xlu1 %1577  ;;  %v1629_v14 = vpop.xlane.xlu0 %1628 }
 0x2fd   : > { %2310 = vrcp.f32 %v1578_v16  ;;  %v2305_v57 = vpop.eup %2304 }
 0x2fe   : > { %2312 = vrcp.f32 %v1629_v14  ;;  %1711 = vxpose.xlu0.b32.cont [12/16] (narrow) %v2305_v57, 8 }
 0x300   : > { %v1581_v26 = vpop.xlane.xlu1 %1580  ;;  %v1632_v8 = vpop.xlane.xlu0 %1631 }
 0x301   : > { %2314 = vrcp.f32 %v1581_v26  ;;  %v2307_v30 = vpop.eup %2306 }
 0x302   : > { %2316 = vrcp.f32 %v1632_v8  ;;  %1679 = vxpose.xlu1.b32.cont [12/16] (narrow) %v2307_v30, 8 }
 0x304   : > { %v1584_v50 = vpop.xlane.xlu1 %1583  ;;  %v1635_v18 = vpop.xlane.xlu0 %1634 }
 0x305   : > { %2318 = vrcp.f32 %v1584_v50 }
 0x306   : > { %v2309_v54 = vpop.eup %2308  ;;  %2320 = vrcp.f32 %v1635_v18 }
 0x307   : > { %1712 = vxpose.xlu0.b32.cont [13/16] (narrow) %v2309_v54, 8 }
 0x309   : > { %v1587_v49 = vpop.xlane.xlu1 %1586 }
 0x30a   : > { %v2311_v23 = vpop.eup %2310  ;;  %2322 = vrcp.f32 %v1587_v49 }
 0x30b   : > { %v2313_v22 = vpop.eup %2312  ;;  %1680 = vxpose.xlu1.b32.cont [13/16] (narrow) %v2311_v23, 8 }
 0x30c   : > { %1713 = vxpose.xlu0.b32.cont [14/16] (narrow) %v2313_v22, 8 }
 0x30e   : > { %v2315_v56 = vpop.eup %2314 }
 0x30f   : > { %v2317_v11 = vpop.eup %2316  ;;  %1681 = vxpose.xlu1.b32.cont [14/16] (narrow) %v2315_v56, 8 }
 0x310   : > { %1714 = vxpose.xlu0.b32.cont [15/16] (narrow) %v2317_v11, 8 }
 0x312   : > { %v2319_v6 = vpop.eup %2318 }
 0x313   : > { %v2321_v46 = vpop.eup %2320  ;;  %1682 = vxpose.xlu1.b32.cont [15/16] (narrow) %v2319_v6, 8 }
 0x314   : > { %1715 = vxpose.xlu0.b32.end [16/16] (narrow) %v2321_v46, 8 }
 0x317   : > { %v2323_v44 = vpop.eup %2322 }
 0x318   : > { %1683 = vxpose.xlu1.b32.end [16/16] (narrow) %v2323_v44, 8 }
 0x354   : > { %v1716_v15 = vpop.trf.xlu0 }
 0x355   : > { %v1739_v37 = vrot.slane %v1716_v15, %v4013_v34 }
 0x357   : > { %v1741_v51 = vmul.f32 %v1739_v37, %v415_v36  ;;  %v1743_v24 = vmul.f32 %v1739_v37, %v421_v17  ;;  %v1745_v52 = vmul.f32 %v1739_v37, %v427_v28  ;;  %v1747_v43 = vmul.f32 %v1739_v37, %v433_v63 }
 0x358   : > { %v1684_v2 = vpop.trf.xlu1 }
 0x359   : > { %v1735_v47 = vrot.slane %v1684_v2, %v4013_v34  ;;  %1820 = vmatprep.mubr.f32.mxu0 %v1741_v51  ;;  %1826 = vmatprep.mubr.f32.mxu1 %v1743_v24 }
 0x35b   : > { %v1740_v21 = vmul.f32 %v1735_v47, %v413_v60  ;;  %v1742_v29 = vmul.f32 %v1735_v47, %v419_v58  ;;  %v1744_v48 = vmul.f32 %v1735_v47, %v425_v62  ;;  %v1746_v9 = vmul.f32 %v1735_v47, %v431_v45 }
 0x35d   : > { %1821 = vmatmul.mubr.f32.vlgmr.msra.gmra.mxu0 %v1740_v21  ;;  %1827 = vmatmul.mubr.f32.vlgmr.msra.gmra.mxu1 %v1742_v29 }
 0x35e   : > { %1832 = vmatprep.mubr.f32.mxu1 %v1745_v52 }
 0x361   : > { %1833 = vmatmul.mubr.f32.gmra.mxu1 %v1744_v48 }
 0x362   : > { %1838 = vmatprep.mubr.f32.mxu1 %v1747_v43 }
 0x365   : > { %1839 = vmatmul.mubr.f32.gmra.mxu1 %v1746_v9 }
 0x41d   : > { %v1822_v32 = vpop.f32.mrf.mxu0  ;;  %v1828_v7 = vpop.f32.mrf.mxu1 }
 0x41e   : > { %1853 = vst [vmem:[%s238_s21] sm:$0xff] %v1822_v32  ;;  %1855 = vst [vmem:[%s238_s21 + $0x10] sm:$0xff] %v1828_v7 }
 0x41f   : > { %v1824_v27 = vpop.f32.mrf.mxu0  ;;  %v1830_v25 = vpop.f32.mrf.mxu1 }
 0x420   : > { %1854 = vst [vmem:[%s238_s21 + $0x8] sm:$0xff] %v1824_v27  ;;  %1856 = vst [vmem:[%s238_s21 + $0x18] sm:$0xff] %v1830_v25 }
 0x421   : > { %v1834_v20 = vpop.f32.mrf.mxu1 }
 0x422   : > { %1857 = vst [vmem:[%s238_s21 + $0x20] sm:$0xff] %v1834_v20 }
 0x423   : > { %v1836_v33 = vpop.f32.mrf.mxu1 }
 0x424   : > { %1858 = vst [vmem:[%s238_s21 + $0x28] sm:$0xff] %v1836_v33 }
 0x425   : > { %v1840_v13 = vpop.f32.mrf.mxu1 }
 0x426   : > { %1859 = vst [vmem:[%s238_s21 + $0x30] sm:$0xff] %v1840_v13 }
 0x427   : > { %v1842_v0 = vpop.f32.mrf.mxu1 }
 0x428   : > { %1860 = vst [vmem:[%s238_s21 + $0x38] sm:$0xff] %v1842_v0 }
 0x429   : > { %2365 = shalt.err (!%p2362_p3)
}
 0x42a   : > { %s2366_s9 = scalar_lea.hbm %s3759_s30, 1024  ;;  %s2370_s12 = scalar_lea.hbm %s3812_s4, 2048 }
 0x42b   : > { %p2367_p5 = scmp.ne.s32.totalorder %s3759_s30, %s2366_s9  ;;  %p2371_p9 = scmp.lt.s32.totalorder %s3759_s30, %s3812_s4 }
 0x42c   : > { %p2372_p10 = scmp.lt.s32.totalorder %s2370_s12, %s2366_s9 }
 0x42d   : > { %p2368_p6 = pnand %p2367_p5, %p2508_p4 }
 0x42e   : > { %p2373_p11 = por %p2372_p10, %p2371_p9 }
 0x42f   : > { %p2369_p7 = pneg %p2368_p6 }
 0x431   : > { %p2374_p12 = pnand %p2373_p11, %p2369_p7 }
 0x433   : > { %2377 = shalt.err (!%p2374_p12)
}
 0x434   : > { %s2441_s21 = smov 256   ;;  %s2442_s22 = smov 16  }
 0x435   : > { %2061 = dma.vmem_to_hbm [thread:$0]  (%p2508_p4), %s3761_s24, 1024, %s3759_s30, %s3763_s5, %s2441_s21, %s2441_s21, %s2442_s22  }
 0x436 PF: > { %p2073_p13 = scmp.ge.s32.totalorder %s2432_s20, 2  ;;  %s1892_s26 = sand.u32 1, %s2412_s15  }
 0x437   : > { %s1893_s29 = scalar_lea.sflag [#allocation6], %s1892_s26 }
 0x438   : > { %p2068_p0 = pnand %p2073_p13, %p2515_p8 }
 0x43a   : > { %p2069_p1 = pneg %p2068_p0 }
 0x43c   : > { %2407 = dma.done.wait (%p2069_p1), %s1893_s29, 1024  }
 0x43d   : > { %2409 = vsyncadd (%p2069_p1), %s1893_s29, 4294966272  ;;  %s18_s20 = sadd.s32 1, %s2432_s20   ;;  %s4014_s15 = smov %s2416_s16 }
 0x43e   : > { %p15_p2 = scmp.ge.s32.totalorder %s18_s20, 4   ;;  %s4015_s16 = smov %s2420_s17 }
 0x43f   : > { %s4016_s17 = smov %s2521_s28  ;;  %s4017_s18 = smov %s2428_s19 }
 0x440   : > { %s4018_s19 = smov %s4020_s23  ;;  %17 = sbr.rel (!%p15_p2) target bundleno = 5 (0x5), region = 83 }
 0x445   :  { %1898 = vsyncpa [#allocation5], 1 }
 0x446   :  { %1900 = vsyncpa [#allocation5 + $0x1], 1 }
 0x447   :  { %1901 = vsyncpa [#allocation6], 1 }
 0x448   :  { %1903 = vsyncpa [#allocation6 + $0x1], 1 }

</bundles_post_ra>
